<compile_context>
chip_gen: v7x
topology: tpu7x:2x2x1
jax: 0.10.0
libtpu: 0.0.40
codegen_flags: <defaults>
</compile_context>

<pallas_src>
import functools

import jax
import jax.numpy as jnp
from jax import lax
from jax.experimental import pallas as pl
from jax.experimental.pallas import tpu as pltpu

_NEG_BIG = -1e30  # finite "-inf": exp() underflows to exactly 0.0, no NaN from inf-inf


def _round_up(x, m):
    return ((x + m - 1) // m) * m


def _vmem_budget_bytes():
    """~78% of physical VMEM (≈100 MiB on v5e/v6e, ≈50 MiB per-TC on v7x)."""
    cap = None
    try:
        cap = getattr(pltpu.get_tpu_info(), "vmem_capacity_bytes", None)
    except Exception:
        cap = None
    if not cap:
        cap = 64 * 1024 * 1024  # conservative fallback (v7x per-TensorCore VMEM)
    cap = min(max(int(cap), 32 * 1024 * 1024), 128 * 1024 * 1024)
    return int(cap * 0.78)


# ---------------------------------------------------------------------------
# Kernel helpers
# ---------------------------------------------------------------------------
def _valid_mask(shape, row0, col0, n_valid):
    """True for real (un-padded) contrast columns that are not the anchor's own
    self-contrast column.  Built from global row/col indices so the diagonal lands
    in the correct tile regardless of the grid position."""
    row = row0 + lax.broadcasted_iota(jnp.int32, shape, 0)
    col = col0 + lax.broadcasted_iota(jnp.int32, shape, 1)
    return jnp.logical_and(row != col, col < n_valid)


def _finalize_loss(log_z, sm, p, loss_scale):
    """loss_i = -scale * sum_j mask_ij (s_ij - log_z_i) / max(sum_j mask_ij, eps)."""
    numer = sm - p * log_z
    denom = jnp.where(p < 1e-6, 1.0, p)
    inv = pl.reciprocal(denom, approx=True)   # EUP slot
    inv = inv * (2.0 - denom * inv)           # one Newton step -> ~f32 exact
    return (-loss_scale) * numer * inv


def _scaled_anchor(a_ref, inv_temperature):
    # Folding 1/T into the [TM, D] anchor block is much cheaper than scaling [TM, N].
    return (a_ref[...].astype(jnp.float32) * inv_temperature).astype(a_ref.dtype)


# ---------------------------------------------------------------------------
# Single-pass kernels (whole contrast slab resident in VMEM)
# ---------------------------------------------------------------------------
def _sp_label_kernel(alab_ref, clab_ref, a_ref, ct_ref, out_ref, *,
                     inv_temperature, loss_scale, n_valid, block_m):
    a = _scaled_anchor(a_ref, inv_temperature)
    # NN matmul against the pre-transposed [D_pad, N_pad] contrast slab, f32 MXU acc.
    s = jnp.dot(a, ct_ref[...], preferred_element_type=jnp.float32)
    valid = _valid_mask(s.shape, pl.program_id(0) * block_m, 0, n_valid)
    pos = jnp.logical_and(alab_ref[...] == clab_ref[...], valid)
    s_m = jnp.where(valid, s, _NEG_BIG)
    m = jnp.max(s_m, axis=1, keepdims=True)
    log_z = m + jnp.log(jnp.sum(jnp.exp(s_m - m), axis=1, keepdims=True))
    sm = jnp.sum(jnp.where(pos, s, 0.0), axis=1, keepdims=True)
    p = jnp.sum(pos.astype(jnp.float32), axis=1, keepdims=True)
    out_ref[...] = _finalize_loss(log_z, sm, p, loss_scale)


def _sp_mask_kernel(mask_ref, a_ref, ct_ref, out_ref, *,
                    inv_temperature, loss_scale, n_valid, block_m):
    a = _scaled_anchor(a_ref, inv_temperature)
    s = jnp.dot(a, ct_ref[...], preferred_element_type=jnp.float32)
    valid = _valid_mask(s.shape, pl.program_id(0) * block_m, 0, n_valid)
    pos_f = jnp.where(valid, mask_ref[...].astype(jnp.float32), 0.0)
    s_m = jnp.where(valid, s, _NEG_BIG)
    m = jnp.max(s_m, axis=1, keepdims=True)
    log_z = m + jnp.log(jnp.sum(jnp.exp(s_m - m), axis=1, keepdims=True))
    sm = jnp.sum(pos_f * s, axis=1, keepdims=True)
    p = jnp.sum(pos_f, axis=1, keepdims=True)
    out_ref[...] = _finalize_loss(log_z, sm, p, loss_scale)


# ---------------------------------------------------------------------------
# Online (tiled contrast) fallback kernels -- flash-style log-sum-exp
# ---------------------------------------------------------------------------
def _online_init(a_ref, a_sc, mu, l_acc, sm_acc, p_acc, inv_temperature):
    @pl.when(pl.program_id(1) == 0)
    def _():
        # 1/T rescale done ONCE per resident anchor row block (hoisted out of j loop).
        a_sc[...] = (a_ref[...].astype(jnp.float32) * inv_temperature).astype(a_sc.dtype)
        mu[...] = jnp.full_like(mu, _NEG_BIG)
        l_acc[...] = jnp.zeros_like(l_acc)
        sm_acc[...] = jnp.zeros_like(sm_acc)
        p_acc[...] = jnp.zeros_like(p_acc)


def _online_update(s_m, sm_contrib, p_contrib, out_ref, mu, l_acc, sm_acc, p_acc,
                   loss_scale):
    mu_prev = mu[...]
    mu_new = jnp.maximum(mu_prev, jnp.max(s_m, axis=1, keepdims=True))
    alpha = jnp.exp(mu_prev - mu_new)
    contrib = jnp.sum(jnp.exp(s_m - mu_new), axis=1, keepdims=True)
    # Guard rows that have not seen any valid column yet (mu_new still -1e30):
    # exp(0) == 1 would otherwise pollute l_acc.
    contrib = jnp.where(mu_new > _NEG_BIG * 0.5, contrib, 0.0)
    l_acc[...] = alpha * l_acc[...] + contrib
    sm_acc[...] = sm_acc[...] + sm_contrib
    p_acc[...] = p_acc[...] + p_contrib
    mu[...] = mu_new

    @pl.when(pl.program_id(1) == pl.num_programs(1) - 1)
    def _():
        log_z = mu[...] + jnp.log(l_acc[...])
        out_ref[...] = _finalize_loss(log_z, sm_acc[...], p_acc[...], loss_scale)


# TODO(synk): gate the diagonal/padding mask construction behind a per-tile lax.cond
# so interior off-diagonal tiles skip the iota/compare/where work entirely.
def _ol_label_kernel(alab_ref, clab_ref, a_ref, ct_ref, out_ref,
                     a_sc, mu, l_acc, sm_acc, p_acc, *,
                     inv_temperature, loss_scale, n_valid, block_m, block_n):
    _online_init(a_ref, a_sc, mu, l_acc, sm_acc, p_acc, inv_temperature)
    s = jnp.dot(a_sc[...], ct_ref[...], preferred_element_type=jnp.float32)
    valid = _valid_mask(s.shape, pl.program_id(0) * block_m,
                        pl.program_id(1) * block_n, n_valid)
    pos = jnp.logical_and(alab_ref[...] == clab_ref[...], valid)
    s_m = jnp.where(valid, s, _NEG_BIG)
    sm_c = jnp.sum(jnp.where(pos, s, 0.0), axis=1, keepdims=True)
    p_c = jnp.sum(pos.astype(jnp.float32), axis=1, keepdims=True)
    _online_update(s_m, sm_c, p_c, out_ref, mu, l_acc, sm_acc, p_acc, loss_scale)


def _ol_mask_kernel(mask_ref, a_ref, ct_ref, out_ref,
                    a_sc, mu, l_acc, sm_acc, p_acc, *,
                    inv_temperature, loss_scale, n_valid, block_m, block_n):
    _online_init(a_ref, a_sc, mu, l_acc, sm_acc, p_acc, inv_temperature)
    s = jnp.dot(a_sc[...], ct_ref[...], preferred_element_type=jnp.float32)
    valid = _valid_mask(s.shape, pl.program_id(0) * block_m,
                        pl.program_id(1) * block_n, n_valid)
    pos_f = jnp.where(valid, mask_ref[...].astype(jnp.float32), 0.0)
    s_m = jnp.where(valid, s, _NEG_BIG)
    sm_c = jnp.sum(pos_f * s, axis=1, keepdims=True)
    p_c = jnp.sum(pos_f, axis=1, keepdims=True)
    _online_update(s_m, sm_c, p_c, out_ref, mu, l_acc, sm_acc, p_acc, loss_scale)


# ---------------------------------------------------------------------------
# Wrapper
# ---------------------------------------------------------------------------
def supervised_simclr_loss(features, labels=None, mask=None, *,
                           temperature=0.07, contrast_mode='all',
                           base_temperature=None, compute_dtype=jnp.bfloat16,
                           block_m=None, block_n=None):
    """JAX/Pallas-TPU forward pass of SupervisedSimCLRLoss (SupCon / SimCLR)."""
    # TODO(synk): forward-only; add a custom_vjp with a fused recompute-based backward.
    temperature = float(temperature)
    base_temperature = temperature if base_temperature is None else float(base_temperature)

    features = jnp.asarray(features)
    if features.ndim < 3:
        raise ValueError('`features` needs to be [bsz, n_views, ...], '
                         'at least 3 dimensions are required')
    if features.ndim > 3:
        features = features.reshape(features.shape[0], features.shape[1], -1)
    bsz, n_views, dim = features.shape
    if labels is not None and mask is not None:
        raise ValueError('Cannot define both `labels` and `mask`')

    contrast_count = n_views
    # torch.cat(torch.unbind(features, dim=1), dim=0): view-major ordering.
    contrast_feature = jnp.transpose(features, (1, 0, 2)).reshape(n_views * bsz, dim)
    if contrast_mode == 'one':
        anchor_feature = features[:, 0]
        anchor_count = 1
    elif contrast_mode == 'all':
        anchor_feature = contrast_feature
        anchor_count = contrast_count
    else:
        raise ValueError('Unknown mode: {}'.format(contrast_mode))

    M = anchor_count * bsz
    N = contrast_count * bsz
    dim_pad = _round_up(max(dim, 128), 128)    # lane-align D; zero padding is exact
    n_pad_full = _round_up(N, 128)

    itemsize = jnp.dtype(compute_dtype).itemsize
    mask_item = itemsize if mask is not None else 0
    budget = _vmem_budget_bytes()

    # VMEM estimates: double-buffered feature tiles + streamed mask tile (if any)
    # + ~8 f32 [TM, TN]-sized in-kernel temporaries + small row vectors / scratch.
    def sp_bytes(bm):
        return (2 * (bm * dim_pad + dim_pad * n_pad_full) * itemsize
                + 2 * bm * n_pad_full * mask_item
                + 8 * bm * n_pad_full * 4 + 64 * bm)

    def ol_bytes(bm, bn):
        return (2 * (bm * dim_pad + dim_pad * bn) * itemsize
                + 2 * bm * bn * mask_item
                + 8 * bm * bn * 4
                + bm * dim_pad * itemsize + 80 * bm)

    # block_m candidates (multiples of 128); prefer >= 2 row tiles so the "parallel"
    # grid axis can split across v7x's two TensorCores.
    m_cap = max(128, _round_up(M, 128))
    cands = [b for b in (512, 256, 128) if b <= m_cap] or [128]

    def _tiles(bm):
        return _round_up(M, bm) // bm

    bm_pref = ([b for b in cands if _tiles(b) >= 2]
               + [b for b in cands if _tiles(b) < 2])

    if block_m is not None:
        block_m = max(128, _round_up(int(block_m), 128))
    if block_n is not None:
        block_n = max(128, _round_up(int(block_n), 128))

    use_online = (block_n is not None) and (block_n < n_pad_full)
    if not use_online:
        # Prefer the single-pass kernel whenever the contrast slab fits the budget.
        if block_m is None:
            fit = [b for b in bm_pref if sp_bytes(b) <= budget]
            if fit:
                block_m = fit[0]
            else:
                use_online = True
        elif sp_bytes(block_m) > budget:
            use_online = True
    if not use_online:
        block_n = n_pad_full
    elif block_m is None or block_n is None:
        pick_bm, pick_bn = 128, 128
        found = False
        for bm in bm_pref:
            for bn in (1024, 512, 256, 128):
                if bn <= n_pad_full and ol_bytes(bm, bn) <= budget:
                    pick_bm, pick_bn, found = bm, bn, True
                    break
            if found:
                break
        block_m = block_m if block_m is not None else pick_bm
        block_n = block_n if block_n is not None else pick_bn
    # TODO(synk): add a feature-dim (K) tiling path for very large flattened D
    # (>= ~8K on v7x) instead of loading full (.., dim_pad) slabs.

    m_pad = _round_up(M, block_m)
    n_pad = _round_up(N, block_n)

    # bf16 feature tiles through DMA / MXU by default; softmax math is f32 in-kernel.
    a = jnp.pad(anchor_feature.astype(compute_dtype),
                ((0, m_pad - M), (0, dim_pad - dim)))
    ct = jnp.pad(jnp.transpose(contrast_feature).astype(compute_dtype),
                 ((0, dim_pad - dim), (0, n_pad - N)))

    common = dict(inv_temperature=1.0 / temperature,
                  loss_scale=temperature / base_temperature,
                  n_valid=N, block_m=block_m)

    if mask is None:
        if labels is None:
            base_labels = jnp.arange(bsz, dtype=jnp.int32)   # SimCLR: own class / sample
        else:
            base_labels = jnp.asarray(labels).reshape(-1).astype(jnp.int32)
            if base_labels.shape[0] != bsz:
                raise ValueError('Num of labels does not match num of features')
        anchor_labels = (base_labels if contrast_mode == 'one'
                         else jnp.tile(base_labels, anchor_count))
        contrast_labels = jnp.tile(base_labels, contrast_count)
        alab = jnp.pad(anchor_labels, (0, m_pad - M)).reshape(m_pad, 1)
        clab = jnp.pad(contrast_labels, (0, n_pad - N)).reshape(1, n_pad)
    else:
        # TODO(synk): index the [bsz, bsz] mask via block arithmetic instead of
        # materializing the tiled [M_pad, N_pad] mask (streamed in compute_dtype,
        # which already halves/quarters the HBM traffic versus f32).
        mask_tiled = jnp.tile(jnp.asarray(mask).astype(compute_dtype),
                              (anchor_count, contrast_count))
        mask_tiled = jnp.pad(mask_tiled, ((0, m_pad - M), (0, n_pad - N)))

    out_shape = jax.ShapeDtypeStruct((m_pad, 1), jnp.float32)

    if not use_online:
        grid = (m_pad // block_m,)
        dim_sem = ("parallel",)
        a_spec = pl.BlockSpec((block_m, dim_pad), lambda i: (i, 0))
        ct_spec = pl.BlockSpec((dim_pad, n_pad), lambda i: (0, 0))
        out_spec = pl.BlockSpec((block_m, 1), lambda i: (i, 0))
        scratch = []
        if mask is None:
            kernel = functools.partial(_sp_label_kernel, **common)
            in_specs = [pl.BlockSpec((block_m, 1), lambda i: (i, 0)),
                        pl.BlockSpec((1, n_pad), lambda i: (0, 0)),
                        a_spec, ct_spec]
            args = (alab, clab, a, ct)
        else:
            kernel = functools.partial(_sp_mask_kernel, **common)
            in_specs = [pl.BlockSpec((block_m, n_pad), lambda i: (i, 0)),
                        a_spec, ct_spec]
            args = (mask_tiled, a, ct)
    else:
        grid = (m_pad // block_m, n_pad // block_n)   # contrast (reduction) axis last
        dim_sem = ("parallel", "arbitrary")
        a_spec = pl.BlockSpec((block_m, dim_pad), lambda i, j: (i, 0))
        ct_spec = pl.BlockSpec((dim_pad, block_n), lambda i, j: (0, j))
        out_spec = pl.BlockSpec((block_m, 1), lambda i, j: (i, 0))
        scratch = ([pltpu.VMEM((block_m, dim_pad), compute_dtype)]
                   + [pltpu.VMEM((block_m, 1), jnp.float32)] * 4)
        common_ol = dict(common, block_n=block_n)
        if mask is None:
            kernel = functools.partial(_ol_label_kernel, **common_ol)
            in_specs = [pl.BlockSpec((block_m, 1), lambda i, j: (i, 0)),
                        pl.BlockSpec((1, block_n), lambda i, j: (0, j)),
                        a_spec, ct_spec]
            args = (alab, clab, a, ct)
        else:
            kernel = functools.partial(_ol_mask_kernel, **common_ol)
            in_specs = [pl.BlockSpec((block_m, block_n), lambda i, j: (i, j)),
                        a_spec, ct_spec]
            args = (mask_tiled, a, ct)

    row_loss = pl.pallas_call(
        kernel,
        out_shape=out_shape,
        grid_spec=pltpu.PrefetchScalarGridSpec(
            num_scalar_prefetch=0,
            grid=grid,
            in_specs=in_specs,
            out_specs=out_spec,
            scratch_shapes=scratch),
        compiler_params=pltpu.CompilerParams(
            dimension_semantics=dim_sem,
            vmem_limit_bytes=budget),
    )(*args)

    # loss.view(anchor_count, batch_size).mean() == mean over all M real anchor rows.
    return jnp.sum(row_loss[:M, 0]) / M


# ---------------------------------------------------------------------------
# Pure-JAX reference (mirrors the PyTorch module) for sanity checking
# ---------------------------------------------------------------------------
def _reference_loss(features, labels=None, mask=None, temperature=0.07,
                    contrast_mode='all', base_temperature=None):
    base_temperature = temperature if base_temperature is None else base_temperature
    bsz, n_views, dim = features.shape
    if mask is None:
        if labels is None:
            mask = jnp.eye(bsz, dtype=jnp.float32)
        else:
            labels = labels.reshape(-1, 1)
            mask = (labels == labels.T).astype(jnp.float32)
    else:
        mask = mask.astype(jnp.float32)
    cf = jnp.transpose(features, (1, 0, 2)).reshape(n_views * bsz, dim)
    if contrast_mode == 'one':
        af, anchor_count = features[:, 0], 1
    else:
        af, anchor_count = cf, n_views
    M, N = anchor_count * bsz, n_views * bsz
    adc = (af @ cf.T) / temperature
    logits = adc - jnp.max(adc, axis=1, keepdims=True)
    mask = jnp.tile(mask, (anchor_count, n_views))
    logits_mask = jnp.ones((M, N), jnp.float32).at[jnp.arange(M), jnp.arange(M)].set(0.0)
    mask = mask * logits_mask
    exp_logits = jnp.exp(logits) * logits_mask
    log_prob = logits - jnp.log(exp_logits.sum(1, keepdims=True))
    mpp = mask.sum(1)
    mpp = jnp.where(mpp < 1e-6, 1.0, mpp)
    mlpp = (mask * log_prob).sum(1) / mpp
    return jnp.mean(-(temperature / base_temperature) * mlpp)


if __name__ == "__main__":
    key = jax.random.PRNGKey(0)
    bsz, n_views, dim = 8, 2, 32
    kf, kl = jax.random.split(key)
    features = jax.random.normal(kf, (bsz, n_views, dim), dtype=jnp.float32)
    features = features / jnp.linalg.norm(features, axis=-1, keepdims=True)
    labels = jax.random.randint(kl, (bsz,), 0, 3)
    explicit_mask = (labels[:, None] == labels[None, :]).astype(jnp.float32)

    # f32 compute path: tight checks of the math (single-pass kernels).
    loss_unsup = supervised_simclr_loss(features, compute_dtype=jnp.float32)
    loss_sup = supervised_simclr_loss(features, labels=labels, compute_dtype=jnp.float32)
    loss_one = supervised_simclr_loss(features, labels=labels, contrast_mode='one',
                                      compute_dtype=jnp.float32)
    loss_mask = supervised_simclr_loss(features, mask=explicit_mask,
                                       compute_dtype=jnp.float32)
    # bf16 MXU path (default: halves DMA bytes / doubles MXU throughput).
    loss_sup_bf16 = supervised_simclr_loss(features, labels=labels)

    # Force the online (tiled-contrast) fallback kernels on a slightly larger problem.
    bsz2 = 80
    kf2, kl2 = jax.random.split(jax.random.PRNGKey(1))
    feats2 = jax.random.normal(kf2, (bsz2, n_views, dim), dtype=jnp.float32)
    feats2 = feats2 / jnp.linalg.norm(feats2, axis=-1, keepdims=True)
    labels2 = jax.random.randint(kl2, (bsz2,), 0, 5)
    mask2 = (labels2[:, None] == labels2[None, :]).astype(jnp.float32)
    loss_ol_lab = supervised_simclr_loss(feats2, labels=labels2, compute_dtype=jnp.float32,
                                         block_m=128, block_n=128)
    loss_ol_msk = supervised_simclr_loss(feats2, mask=mask2, compute_dtype=jnp.float32,
                                         block_m=128, block_n=128)

    jax.block_until_ready((loss_unsup, loss_sup, loss_one, loss_mask, loss_sup_bf16,
                           loss_ol_lab, loss_ol_msk))

    ref_unsup = _reference_loss(features)
    ref_sup = _reference_loss(features, labels=labels)
    ref_one = _reference_loss(features, labels=labels, contrast_mode='one')
    ref_sup2 = _reference_loss(feats2, labels=labels2)

    assert jnp.allclose(loss_unsup, ref_unsup, atol=2e-3, rtol=2e-3), (loss_unsup, ref_unsup)
    assert jnp.allclose(loss_sup, ref_sup, atol=2e-3, rtol=2e-3), (loss_sup, ref_sup)
    assert jnp.allclose(loss_one, ref_one, atol=2e-3, rtol=2e-3), (loss_one, ref_one)
    assert jnp.allclose(loss_mask, ref_sup, atol=2e-3, rtol=2e-3), (loss_mask, ref_sup)
    assert jnp.allclose(loss_sup_bf16, ref_sup, atol=5e-2, rtol=5e-2), (loss_sup_bf16, ref_sup)
    assert jnp.allclose(loss_ol_lab, ref_sup2, atol=2e-3, rtol=2e-3), (loss_ol_lab, ref_sup2)
    assert jnp.allclose(loss_ol_msk, ref_sup2, atol=2e-3, rtol=2e-3), (loss_ol_msk, ref_sup2)

    print("KERNEL_OK")
</pallas_src>

<mosaic_0001>
module attributes {stable_mosaic.version = 11 : i64} {
  func.func @_sp_label_kernel(%arg0: i32, %arg1: memref<128x1xi32, #tpu.memory_space<vmem>>, %arg2: memref<1x128xi32, #tpu.memory_space<vmem>>, %arg3: memref<128x128xf32, #tpu.memory_space<vmem>>, %arg4: memref<128x128xf32, #tpu.memory_space<vmem>>, %arg5: memref<128x1xf32, #tpu.memory_space<vmem>>) attributes {dimension_semantics = [#tpu.dimension_semantics<parallel>], iteration_bounds = array<i64: 1>, scalar_prefetch = 0 : i64, scratch_operands = 0 : i64, tpu.core_type = #tpu.core_type<tc>, window_params = [{transform_indices = @transform_0, window_bounds = array<i64: 128, 1>}, {pipeline_mode = #tpu.pipeline_mode<synchronous>, transform_indices = @transform_1, window_bounds = array<i64: 1, 128>}, {transform_indices = @transform_2, window_bounds = array<i64: 128, 128>}, {pipeline_mode = #tpu.pipeline_mode<synchronous>, transform_indices = @transform_3, window_bounds = array<i64: 128, 128>}, {transform_indices = @transform_4, window_bounds = array<i64: 128, 1>}]} {
    %c0 = arith.constant 0 : index
    %c0_0 = arith.constant 0 : index
    %0 = vector.load %arg3[%c0, %c0_0] : memref<128x128xf32, #tpu.memory_space<vmem>>, vector<128x128xf32>
    %cst = arith.constant 14.2857141 : f32
    %1 = vector.broadcast %cst : f32 to vector<128x128xf32>
    %2 = arith.mulf %0, %1 : vector<128x128xf32>
    %c0_1 = arith.constant 0 : index
    %c0_2 = arith.constant 0 : index
    %3 = vector.load %arg4[%c0_1, %c0_2] : memref<128x128xf32, #tpu.memory_space<vmem>>, vector<128x128xf32>
    %cst_3 = arith.constant dense<0.000000e+00> : vector<128x128xf32>
    %4 = tpu.matmul %2, %3, %cst_3 {dimension_numbers = #tpu.dot_dimension_numbers<[1], [0], [0], [1], [0, 0, 1, 1], [], []>} : vector<128x128xf32>, vector<128x128xf32>, vector<128x128xf32> -> vector<128x128xf32>
    %c128_i32 = arith.constant 128 : i32
    %5 = arith.muli %arg0, %c128_i32 : i32
    %6 = tpu.iota {dimensions = array<i32: 0>} : vector<128x128xi32>
    %7 = vector.broadcast %5 : i32 to vector<128x128xi32>
    %8 = arith.addi %7, %6 : vector<128x128xi32>
    %9 = tpu.iota {dimensions = array<i32: 1>} : vector<128x128xi32>
    %c0_i32 = arith.constant 0 : i32
    %10 = vector.broadcast %c0_i32 : i32 to vector<128x128xi32>
    %11 = arith.addi %10, %9 : vector<128x128xi32>
    %12 = arith.cmpi ne, %8, %11 : vector<128x128xi32>
    %c16_i32 = arith.constant 16 : i32
    %13 = vector.broadcast %c16_i32 : i32 to vector<128x128xi32>
    %14 = arith.cmpi slt, %11, %13 : vector<128x128xi32>
    %15 = arith.andi %12, %14 : vector<128x128xi1>
    %c0_4 = arith.constant 0 : index
    %c0_5 = arith.constant 0 : index
    %16 = vector.load %arg1[%c0_4, %c0_5] : memref<128x1xi32, #tpu.memory_space<vmem>>, vector<128x1xi32>
    %c0_6 = arith.constant 0 : index
    %c0_7 = arith.constant 0 : index
    %17 = vector.load %arg2[%c0_6, %c0_7] : memref<1x128xi32, #tpu.memory_space<vmem>>, vector<1x128xi32>
    %18 = vector.broadcast %16 : vector<128x1xi32> to vector<128x128xi32>
    %19 = vector.broadcast %17 : vector<1x128xi32> to vector<128x128xi32>
    %20 = arith.cmpi eq, %18, %19 : vector<128x128xi32>
    %21 = arith.andi %20, %15 : vector<128x128xi1>
    %cst_8 = arith.constant -1.000000e+30 : f32
    %22 = vector.broadcast %cst_8 : f32 to vector<128x128xf32>
    %23 = arith.select %15, %4, %22 : vector<128x128xi1>, vector<128x128xf32>
    %cst_9 = arith.constant dense<0xFF800000> : vector<128xf32>
    %24 = vector.multi_reduction <maximumf>, %23, %cst_9 [1] : vector<128x128xf32> to vector<128xf32>
    %25 = vector.shape_cast %24 : vector<128xf32> to vector<128x1xf32>
    %26 = vector.broadcast %25 : vector<128x1xf32> to vector<128x128xf32>
    %27 = arith.subf %23, %26 : vector<128x128xf32>
    %28 = math.exp %27 : vector<128x128xf32>
    %cst_10 = arith.constant dense<0.000000e+00> : vector<128xf32>
    %29 = vector.multi_reduction <add>, %28, %cst_10 [1] : vector<128x128xf32> to vector<128xf32>
    %30 = vector.shape_cast %29 : vector<128xf32> to vector<128x1xf32>
    %31 = math.log %30 : vector<128x1xf32>
    %32 = arith.addf %25, %31 : vector<128x1xf32>
    %cst_11 = arith.constant 0.000000e+00 : f32
    %33 = vector.broadcast %cst_11 : f32 to vector<128x128xf32>
    %34 = arith.select %21, %4, %33 : vector<128x128xi1>, vector<128x128xf32>
    %cst_12 = arith.constant dense<0.000000e+00> : vector<128xf32>
    %35 = vector.multi_reduction <add>, %34, %cst_12 [1] : vector<128x128xf32> to vector<128xf32>
    %36 = vector.shape_cast %35 : vector<128xf32> to vector<128x1xf32>
    %37 = arith.extui %21 : vector<128x128xi1> to vector<128x128xi32>
    %38 = arith.sitofp %37 : vector<128x128xi32> to vector<128x128xf32>
    %cst_13 = arith.constant dense<0.000000e+00> : vector<128xf32>
    %39 = vector.multi_reduction <add>, %38, %cst_13 [1] : vector<128x128xf32> to vector<128xf32>
    %40 = vector.shape_cast %39 : vector<128xf32> to vector<128x1xf32>
    %41 = arith.mulf %40, %32 : vector<128x1xf32>
    %42 = arith.subf %36, %41 : vector<128x1xf32>
    %cst_14 = arith.constant 9.99999997E-7 : f32
    %43 = vector.broadcast %cst_14 : f32 to vector<128x1xf32>
    %44 = arith.cmpf olt, %40, %43 : vector<128x1xf32>
    %cst_15 = arith.constant 1.000000e+00 : f32
    %45 = vector.broadcast %cst_15 : f32 to vector<128x1xf32>
    %46 = arith.select %44, %45, %40 : vector<128x1xi1>, vector<128x1xf32>
    %47 = tpu.reciprocal %46 {approx = true} : vector<128x1xf32> -> vector<128x1xf32>
    %48 = arith.mulf %46, %47 : vector<128x1xf32>
    %cst_16 = arith.constant 2.000000e+00 : f32
    %49 = vector.broadcast %cst_16 : f32 to vector<128x1xf32>
    %50 = arith.subf %49, %48 : vector<128x1xf32>
    %51 = arith.mulf %47, %50 : vector<128x1xf32>
    %cst_17 = arith.constant -1.000000e+00 : f32
    %52 = vector.broadcast %cst_17 : f32 to vector<128x1xf32>
    %53 = arith.mulf %52, %42 : vector<128x1xf32>
    %54 = arith.mulf %53, %51 : vector<128x1xf32>
    %c0_18 = arith.constant 0 : index
    %c0_19 = arith.constant 0 : index
    %55 = vector.load %arg5[%c0_18, %c0_19] : memref<128x1xf32, #tpu.memory_space<vmem>>, vector<128x1xf32>
    tpu.vector_store %arg5[%c0_18, %c0_19], %54 {strides = array<i32>} : memref<128x1xf32, #tpu.memory_space<vmem>>, vector<128x1xf32>,
    return
  }
  func.func @transform_0(%arg0: i32) -> (i32, i32) {
    %c0_i32 = arith.constant 0 : i32
    %c0_i32_0 = arith.constant 0 : i32
    return %arg0, %c0_i32 : i32, i32
  }
  func.func @transform_1(%arg0: i32) -> (i32, i32) {
    %c0_i32 = arith.constant 0 : i32
    %c0_i32_0 = arith.constant 0 : i32
    %c0_i32_1 = arith.constant 0 : i32
    return %c0_i32, %c0_i32_0 : i32, i32
  }
  func.func @transform_2(%arg0: i32) -> (i32, i32) {
    %c0_i32 = arith.constant 0 : i32
    %c0_i32_0 = arith.constant 0 : i32
    return %arg0, %c0_i32 : i32, i32
  }
  func.func @transform_3(%arg0: i32) -> (i32, i32) {
    %c0_i32 = arith.constant 0 : i32
    %c0_i32_0 = arith.constant 0 : i32
    %c0_i32_1 = arith.constant 0 : i32
    return %c0_i32, %c0_i32_0 : i32, i32
  }
  func.func @transform_4(%arg0: i32) -> (i32, i32) {
    %c0_i32 = arith.constant 0 : i32
    %c0_i32_0 = arith.constant 0 : i32
    return %arg0, %c0_i32 : i32, i32
  }
}

</mosaic_0001>

<bundles_post_ra>
// kernel: tpu_custom_call.1
= control target key start
LH: loop header
LB: loop body
LE: loop exit
PB: predicated region body
PF: predicated region fallthrough
CT: control target
= control target key end

     0   :  { %9 = vsyncpa [#allocation3], 0  ;;  %s1145_s15 = smov [#allocation2]   ;;  %s2207_s0 = inlined_call_operand.vmem [shape: s32[128,1], index: 0, kind: input, shape index: {}]   ;;  %s2208_s1 = inlined_call_operand.vmem [shape: s32[1,128], index: 1, kind: input, shape index: {}]   ;;  %s2209_s2 = inlined_call_operand.vmem [shape: f32[128,128], index: 2, kind: input, shape index: {}]   ;;  %s2210_s3 = inlined_call_operand.hbm [shape: f32[128,128], index: 3, kind: input, shape index: {}]   ;;  %s2211_s4 = inlined_call_operand.vmem [shape: f32[128,1], index: 4, kind: output, shape index: {}]  }
   0x1   :  { %s21_s16 = sshll.u32 %s1145_s15, 4  ;;  %s1121_s19 = scalar_lea.hbm %s2210_s3, 2048  ;;  %s22_s16 = int_to_ptr.vmem [resolvable:$true] %s21_s16 }
   0x2   :  { %p1122_p0 = scmp.ne.s32.totalorder %s2210_s3, %s1121_s19  ;;  %p1125_p1 = scmp.lt.u32.totalorder %s1121_s19, %s2210_s3 }
   0x4   :  { %p1127_p2 = pnand %p1125_p1, %p1122_p0 }
   0x6   :  { %1130 = shalt.err (!%p1127_p2)
}
   0x7   :  { %s1131_s24 = scalar_lea.vmem %s22_s16, 2048  ;;  %p1136_p4 = scmp.lt.s32.totalorder %s22_s16, %s22_s16 }
   0x8   :  { %p1132_p3 = scmp.ne.s32.totalorder %s22_s16, %s1131_s24  ;;  %p1137_p5 = scmp.lt.s32.totalorder %s1131_s24, %s1131_s24 }
   0xa   :  { %p1138_p6 = por %p1137_p5, %p1136_p4 }
   0xc   :  { %p1139_p7 = pnand %p1138_p6, %p1132_p3 }
   0xe   :  { %1142 = shalt.err (!%p1139_p7)
}
   0xf   :  { %s1146_s25 = smov 128   ;;  %s1147_s26 = smov 8  }
  0x10   :  { %27 = dma.hbm_to_vmem [thread:$0]  %s2210_s3, 2048, %s22_s16, [#allocation3], %s1146_s25, %s1146_s25, %s1147_s26  }
  0x11   :  { %1143 = dma.done.wait [#allocation3], 2048  }
  0x12   :  { %1144 = vsyncadd [#allocation3], 4294965248  ;;  %v1148_v0 = vmov 0   ;;  %v63_v1 = vld [vmem:[#allocation2] sm:$0xff]  ;;  %v64_v2 = vld [vmem:[#allocation2 + $0x8] sm:$0xff] }
  0x13   :  { %1024 = vset.pattern.permute.xlu1 %v1148_v0  ;;  %1023 = vset.pattern.permute.xlu0 %v1148_v0  ;;  %v65_v3 = vld [vmem:[#allocation2 + $0x10] sm:$0xff]  ;;  %v970_v4 = vpack.c.bf16 %v64_v2, %v63_v1  ;;  %v66_v5 = vld [vmem:[#allocation2 + $0x18] sm:$0xff]  ;;  %v67_v7 = vld [vmem:[#allocation2 + $0x20] sm:$0xff] }
  0x14   :  { %v974_v6 = vpack.c.bf16 %v66_v5, %v65_v3  ;;  %v68_v8 = vld [vmem:[#allocation2 + $0x28] sm:$0xff]  ;;  %v31_v10 = vld [vmem:[%s2209_s2] sm:$0xff]  ;;  %v69_v12 = vld [vmem:[#allocation2 + $0x30] sm:$0xff] }
  0x15   :  { %971 = vmatprep.subr.bf16.mxu0 %v970_v4  ;;  %1002 = vmatprep.subr.bf16.mxu1 %v970_v4  ;;  %v978_v9 = vpack.c.bf16 %v68_v8, %v67_v7  ;;  %v39_v11 = vld [vmem:[%s2209_s2 + $0x40] sm:$0xff]  ;;  %v70_v13 = vld [vmem:[#allocation2 + $0x38] sm:$0xff]  ;;  %v47_v14 = vmul.f32 14.285714, %v31_v10  ;;  %v72_v18 = vld [vmem:[#allocation2 + $0x48] sm:$0xff]  ;;  %v225_v10 = vlaneseq }
  0x16   :  { %973 = vmatpush3.bf16.msra.mxu0 %v970_v4  ;;  %1010 = vmatpush3.bf16.msra.mxu1 %v970_v4  ;;  %v55_v15 = vmul.f32 14.285714, %v39_v11  ;;  %v982_v16 = vpack.c.bf16 %v70_v13, %v69_v12  ;;  %v71_v17 = vld [vmem:[#allocation2 + $0x40] sm:$0xff]  ;;  %v296_v20 = vld [vmem:[%s2207_s0 + $0x10] sm:$0xff]  ;;  %v74_v22 = vld [vmem:[#allocation2 + $0x58] sm:$0xff] }
  0x17   :  { %975 = vmatprep.subr.bf16.mxu0 %v974_v6  ;;  %1003 = vmatprep.subr.bf16.mxu1 %v974_v6  ;;  %v986_v19 = vpack.c.bf16 %v72_v18, %v71_v17  ;;  %v73_v21 = vld [vmem:[#allocation2 + $0x50] sm:$0xff]  ;;  %v294_v23 = vld [vmem:[%s2207_s0] sm:$0xff]  ;;  %v297_v24 = vld [vmem:[%s2207_s0 + $0x18] sm:$0xff]  ;;  %v1283_v13 = vshrl.u32 %v225_v10, 7 }
  0x18   :  { %946 = vmatprep.mubr.f32.mxu0 %v47_v14  ;;  %958 = vmatprep.mubr.f32.mxu1 %v55_v15  ;;  %v295_v25 = vld [vmem:[%s2207_s0 + $0x8] sm:$0xff]  ;;  %v990_v26 = vpack.c.bf16 %v74_v22, %v73_v21  ;;  %v75_v27 = vld [vmem:[#allocation2 + $0x60] sm:$0xff]  ;;  %v77_v32 = vld [vmem:[#allocation2 + $0x70] sm:$0xff] }
  0x19   :  { %318 = vperm.xlu1 %1024, %v296_v20   ;;  %312 = vperm.xlu0 %1023, %v294_v23   ;;  %v76_v28 = vld [vmem:[#allocation2 + $0x68] sm:$0xff]  ;;  %v298_v30 = vld [vmem:[%s2207_s0 + $0x20] sm:$0xff]  ;;  %v78_v33 = vld [vmem:[#allocation2 + $0x78] sm:$0xff]  ;;  %v235_v15 = vadd.s32 72, %v1283_v13  ;;  %v227_v17 = vadd.s32 8, %v1283_v13  ;;  %v229_v20 = vadd.s32 24, %v1283_v13 }
  0x1a   :  { %977 = vmatpush3.bf16.msra.mxu0 %v974_v6  ;;  %1011 = vmatpush3.bf16.msra.mxu1 %v974_v6  ;;  %v299_v29 = vld [vmem:[%s2207_s0 + $0x28] sm:$0xff]  ;;  %v994_v31 = vpack.c.bf16 %v76_v28, %v75_v27  ;;  %v300_v34 = vld [vmem:[%s2207_s0 + $0x30] sm:$0xff]  ;;  %v301_v35 = vld [vmem:[%s2207_s0 + $0x38] sm:$0xff]  ;;  %v998_v36 = vpack.c.bf16 %v78_v33, %v77_v32  ;;  %v236_v22 = vadd.s32 80, %v1283_v13  ;;  %v228_v23 = vadd.s32 16, %v1283_v13 }
  0x1b   :  { %979 = vmatprep.subr.bf16.mxu0 %v978_v9  ;;  %1004 = vmatprep.subr.bf16.mxu1 %v978_v9  ;;  %v302_v37 = vld [vmem:[%s2207_s0 + $0x40] sm:$0xff]  ;;  %v32_v38 = vld [vmem:[%s2209_s2 + $0x8] sm:$0xff]  ;;  %v304_v40 = vld [vmem:[%s2207_s0 + $0x50] sm:$0xff]  ;;  %v230_v28 = vadd.s32 32, %v1283_v13  ;;  %v240_v33 = vadd.s32 112, %v1283_v13 }
  0x1c   :  { %v40_v39 = vld [vmem:[%s2209_s2 + $0x48] sm:$0xff]  ;;  %v33_v41 = vld [vmem:[%s2209_s2 + $0x10] sm:$0xff]  ;;  %v48_v43 = vmul.f32 14.285714, %v32_v38  ;;  %v34_v48 = vld [vmem:[%s2209_s2 + $0x18] sm:$0xff] }
  0x1d   :  { %321 = vperm.xlu1 %1024, %v297_v24   ;;  %315 = vperm.xlu0 %1023, %v295_v25   ;;  %v41_v42 = vld [vmem:[%s2209_s2 + $0x50] sm:$0xff]  ;;  %v56_v44 = vmul.f32 14.285714, %v40_v39  ;;  %v303_v45 = vld [vmem:[%s2207_s0 + $0x48] sm:$0xff]  ;;  %v49_v46 = vmul.f32 14.285714, %v33_v41 }
  0x1e   :  { %981 = vmatpush3.bf16.msra.mxu0 %v978_v9  ;;  %1012 = vmatpush3.bf16.msra.mxu1 %v978_v9  ;;  %v57_v47 = vmul.f32 14.285714, %v41_v42  ;;  %v42_v49 = vld [vmem:[%s2209_s2 + $0x58] sm:$0xff]  ;;  %v35_v50 = vld [vmem:[%s2209_s2 + $0x20] sm:$0xff]  ;;  %v50_v53 = vmul.f32 14.285714, %v34_v48 }
  0x1f   :  { %983 = vmatprep.subr.bf16.mxu0 %v982_v16  ;;  %1005 = vmatprep.subr.bf16.mxu1 %v982_v16  ;;  %v43_v51 = vld [vmem:[%s2209_s2 + $0x60] sm:$0xff]  ;;  %v58_v54 = vmul.f32 14.285714, %v42_v49  ;;  %v305_v55 = vld [vmem:[%s2207_s0 + $0x58] sm:$0xff]  ;;  %v51_v56 = vmul.f32 14.285714, %v35_v50 }
  0x20   :  { %v306_v52 = vld [vmem:[%s2207_s0 + $0x60] sm:$0xff]  ;;  %v36_v57 = vld [vmem:[%s2209_s2 + $0x28] sm:$0xff]  ;;  %v59_v58 = vmul.f32 14.285714, %v43_v51  ;;  %v37_v60 = vld [vmem:[%s2209_s2 + $0x30] sm:$0xff]  ;;  %v237_v25 = vadd.s32 88, %v1283_v13 }
  0x21   :  { %327 = vperm.xlu1 %1024, %v299_v29   ;;  %324 = vperm.xlu0 %1023, %v298_v30   ;;  %v44_v59 = vld [vmem:[%s2209_s2 + $0x68] sm:$0xff]  ;;  %v45_v61 = vld [vmem:[%s2209_s2 + $0x70] sm:$0xff]  ;;  %v52_v62 = vmul.f32 14.285714, %v36_v57  ;;  %v53_v1 = vmul.f32 14.285714, %v37_v60 }
  0x22   :  { %985 = vmatpush3.bf16.msra.mxu0 %v982_v16  ;;  %1013 = vmatpush3.bf16.msra.mxu1 %v982_v16  ;;  %v60_v63 = vmul.f32 14.285714, %v44_v59  ;;  %v307_v0 = vld [vmem:[%s2207_s0 + $0x68] sm:$0xff]  ;;  %v38_v2 = vld [vmem:[%s2209_s2 + $0x38] sm:$0xff]  ;;  %v61_v3 = vmul.f32 14.285714, %v45_v61 }
  0x23   :  { %987 = vmatprep.subr.bf16.mxu0 %v986_v19  ;;  %1006 = vmatprep.subr.bf16.mxu1 %v986_v19  ;;  %v46_v4 = vld [vmem:[%s2209_s2 + $0x78] sm:$0xff]  ;;  %v54_v5 = vmul.f32 14.285714, %v38_v2  ;;  %v1288_v16 = vand.u32 127, %v225_v10  ;;  %v1330_v30 = vld [vmem:[%s2208_s1] ss:$0 sm:$0xff] }
  0x24   :  { %v62_v6 = vmul.f32 14.285714, %v46_v4  ;;  %v2263_v41 = vmov 0  ;;  %v233_v42 = vadd.s32 56, %v1283_v13  ;;  %v2270_v51 = vmov 0  ;;  %v309_v2 = vld [vmem:[%s2207_s0 + $0x78] sm:$0xff] }
  0x25   :  { %330 = vperm.xlu1 %1024, %v300_v34   ;;  %333 = vperm.xlu0 %1023, %v301_v35   ;;  %vm270_vm0 = vcmp.ne.s32.totalorder %v235_v15, %v1288_v16  ;;  %vm2213_vm1 = vcmp.lt.s32.totalorder %v1288_v16, 16  ;;  %vm262_vm2 = vcmp.ne.s32.totalorder %v227_v17, %v1288_v16  ;;  %vm261_vm5 = vcmp.ne.s32.totalorder %v1283_v13, %v1288_v16 }
  0x26   :  { %989 = vmatpush3.bf16.msra.mxu0 %v986_v19  ;;  %1014 = vmatpush3.bf16.msra.mxu1 %v986_v19  ;;  %v234_v19 = vadd.s32 64, %v1283_v13  ;;  %vm1303_vm4 = vmand %vm270_vm0, %vm2213_vm1  ;;  %vm264_vm7 = vcmp.ne.s32.totalorder %v229_v20, %v1288_v16  ;;  %vm271_vm9 = vcmp.ne.s32.totalorder %v236_v22, %v1288_v16  ;;  %vm263_vm11 = vcmp.ne.s32.totalorder %v228_v23, %v1288_v16 }
  0x27   :  { %991 = vmatprep.subr.bf16.mxu0 %v990_v26  ;;  %1007 = vmatprep.subr.bf16.mxu1 %v990_v26  ;;  %vm1312_vm6 = vmand %vm262_vm2, %vm2213_vm1  ;;  %vm272_vm13 = vcmp.ne.s32.totalorder %v237_v25, %v1288_v16  ;;  %v2255_v34 = vmov 0  ;;  %vm265_vm0 = vcmp.ne.s32.totalorder %v230_v28, %v1288_v16  ;;  %v2295_v17 = vmov 0 }
  0x28   :  { %vm269_vm3 = vcmp.ne.s32.totalorder %v234_v19, %v1288_v16  ;;  %vm1334_vm10 = vmand %vm261_vm5, %vm2213_vm1  ;;  %v232_v20 = vadd.s32 48, %v1283_v13  ;;  %v231_v24 = vadd.s32 40, %v1283_v13  ;;  %v2223_v10 = vmov 0.0  }
  0x29   :  { %336 = vperm.xlu1 %1024, %v302_v37   ;;  %342 = vperm.xlu0 %1023, %v304_v40   ;;  %vm1322_vm8 = vmand %vm269_vm3, %vm2213_vm1  ;;  %v238_v40 = vadd.s32 96, %v1283_v13  ;;  %v239_v37 = vadd.s32 104, %v1283_v13 }
  0x2a   :  { %993 = vmatpush3.bf16.msra.mxu0 %v990_v26  ;;  %1015 = vmatpush3.bf16.msra.mxu1 %v990_v26  ;;  %vm1341_vm12 = vmand %vm264_vm7, %vm2213_vm1 }
  0x2b   :  { %995 = vmatprep.subr.bf16.mxu0 %v994_v31  ;;  %1008 = vmatprep.subr.bf16.mxu1 %v994_v31  ;;  %vm1349_vm15 = vmand %vm271_vm9, %vm2213_vm1 }
  0x2c   :  { %v2256_v34 = vsel %vm1349_vm15, 4294967295, %v2255_v34  ;;  %vm1357_vm3 = vmand %vm263_vm11, %vm2213_vm1 }
  0x2d   :  { %339 = vperm.xlu1 %1024, %v303_v45   ;;  %348 = vperm.xlu0 %1023, %v306_v52   ;;  %vm1364_vm7 = vmand %vm272_vm13, %vm2213_vm1 }
  0x2e   :  { %997 = vmatpush3.bf16.msra.mxu0 %v994_v31  ;;  %1016 = vmatpush3.bf16.msra.mxu1 %v994_v31  ;;  %v2251_v31 = vmov 0  ;;  %vm1371_vm15 = vmand %vm265_vm0, %vm2213_vm1 }
  0x2f   :  { %999 = vmatprep.subr.bf16.mxu0 %v998_v36  ;;  %1009 = vmatprep.subr.bf16.mxu1 %v998_v36  ;;  %v2252_v31 = vsel %vm1334_vm10, 4294967295, %v2251_v31 }
  0x31   :  { %345 = vperm.xlu1 %1024, %v305_v55  }
  0x32   :  { %1001 = vmatpush3.bf16.msra.mxu0 %v998_v36  ;;  %1017 = vmatpush3.bf16.msra.mxu1 %v998_v36 }
  0x35   :  { %947 = vmatmul.mubr.f32.vlgmr.msra.gmra.mrb[0].mxu0 %v48_v43  ;;  %959 = vmatmul.mubr.f32.vlgmr.msra.gmra.mrb[0].mxu1 %v56_v44  ;;  %v2265_v43 = vmov 0 }
  0x36   :  { %949 = vmatprep.mubr.f32.mxu0 %v49_v46  ;;  %961 = vmatprep.mubr.f32.mxu1 %v57_v47  ;;  %v2267_v46 = vmov 0 }
  0x37   :  { %351 = vperm.xlu1 %1024, %v307_v0  }
  0x39   :  { %950 = vmatmul.mubr.f32.gmra.mrb[2].mxu0 %v50_v53  ;;  %962 = vmatmul.mubr.f32.gmra.mrb[2].mxu1 %v58_v54 }
  0x3a   :  { %952 = vmatprep.mubr.f32.mxu0 %v51_v56  ;;  %964 = vmatprep.mubr.f32.mxu1 %v59_v58  ;;  %v2275_v56 = vmov 0 }
  0x3d   :  { %953 = vmatmul.mubr.f32.gmra.mrb[4].mxu0 %v52_v62  ;;  %965 = vmatmul.mubr.f32.gmra.mrb[4].mxu1 %v60_v63 }
  0x3e   :  { %955 = vmatprep.mubr.f32.mxu0 %v53_v1  ;;  %967 = vmatprep.mubr.f32.mxu1 %v61_v3 }
  0x41   :  { %956 = vmatmul.mubr.f32.gmra.mrb[6].mxu0 %v54_v5  ;;  %968 = vmatmul.mubr.f32.gmra.mrb[6].mxu1 %v62_v6 }
  0x98   :  { %v319_v7 = vpop.permute.xlu1 %318  ;;  %v1279_v9 = vpop.permute.xlu0 %312 }
  0x9c   :  { %v1277_v8 = vpop.permute.xlu1 %321  ;;  %v316_v12 = vpop.permute.xlu0 %315 }
  0x9d   :  { %vm364_vm14 = vcmp.eq.s32.totalorder %v316_v12, %v1330_v30  ;;  %vm366_vm13 = vcmp.eq.s32.totalorder %v1277_v8, %v1330_v30 }
  0x9e   :  { %vm1378_vm11 = vmand %vm364_vm14, %vm1312_vm6 }
  0x9f   :  { %v2264_v41 = vsel %vm1378_vm11, 4294967295, %v2263_v41 }
  0xa0   :  { %v1281_v11 = vpop.permute.xlu1 %327  ;;  %v1291_v18 = vpop.permute.xlu0 %324 }
  0xa4   :  { %v1285_v14 = vpop.permute.xlu1 %330  ;;  %v1316_v27 = vpop.permute.xlu0 %333 }
  0xa8   :  { %v337_v21 = vpop.permute.xlu1 %336  ;;  %v343_v36 = vpop.permute.xlu0 %342 }
  0xa9   :  { %vm371_vm2 = vcmp.eq.s32.totalorder %v337_v21, %v1330_v30  ;;  %vm373_vm14 = vcmp.eq.s32.totalorder %v343_v36, %v1330_v30 }
  0xaa   :  { %vm1387_vm9 = vmand %vm371_vm2, %vm1322_vm8 }
  0xab   :  { %v2266_v43 = vsel %vm1387_vm9, 4294967295, %v2265_v43  ;;  %vm2284_vm9 = vcmp.ne.s32.totalorder %v238_v40, %v1288_v16 }
  0xac   :  { %v340_v32 = vpop.permute.xlu1 %339  ;;  %v349_v52 = vpop.permute.xlu0 %348 }
  0xad   :  { %vm372_vm5 = vcmp.eq.s32.totalorder %v340_v32, %v1330_v30 }
  0xae   :  { %vm1398_vm0 = vmand %vm372_vm5, %vm1303_vm4  ;;  %vm2269_vm5 = vcmp.eq.s32.totalorder %v319_v7, %v1330_v30  ;;  %v2292_v7 = vmov 0 }
  0xaf   :  { %v2268_v46 = vsel %vm1398_vm0, 4294967295, %v2267_v46  ;;  %vm1421_vm1 = vmand %vm2269_vm5, %vm1357_vm3  ;;  %vm2283_vm0 = vcmp.lt.s32.totalorder %v1288_v16, 16 }
  0xb0   :  { %v346_v38 = vpop.permute.xlu1 %345  ;;  %v2271_v51 = vsel %vm1421_vm1, 4294967295, %v2270_v51  ;;  %vm1488_vm11 = vmand %vm2284_vm9, %vm2283_vm0  ;;  %vm2291_vm9 = vcmp.eq.s32.totalorder %v1291_v18, %v1330_v30 }
 0x108   :  { %v1391_v44 = vpop.f32.mrb[0].mxu0  ;;  %v1393_v45 = vpop.f32.mrb[0].mxu1 }
 0x109   :  { %v1402_v47 = vpop.f32.mrb[1].mxu1  ;;  %v1407_v48 = vsel %vm1303_vm4, %v1393_v45, -1e+30  ;;  %v1412_v49 = vsel %vm1312_vm6, %v1391_v44, -1e+30  ;;  %v1414_v50 = vpop.f32.mrb[1].mxu0  ;;  %vm1433_vm6 = vmand %vm366_vm13, %vm1341_vm12  ;;  %vm2274_vm4 = vnez %v2256_v34  ;;  %vm375_vm13 = vcmp.eq.s32.totalorder %v349_v52, %v1330_v30 }
 0x10a   :  { %429 = vmax.xlane.f32.xlu0 %v1407_v48  ;;  %413 = vmax.xlane.f32.xlu1 %v1412_v49  ;;  %v1443_v55 = vsel %vm1334_vm10, %v1414_v50, -1e+30  ;;  %vm1450_vm2 = vmand %vm373_vm14, %vm2274_vm4  ;;  %vm2279_vm14 = vcmp.eq.s32.totalorder %v346_v38, %v1330_v30  ;;  %v1477_v62 = vsel %vm1322_vm8, %v1402_v47, -1e+30 }
 0x10b   :  { %v2276_v56 = vsel %vm1450_vm2, 4294967295, %v2275_v56  ;;  %vm1470_vm5 = vmand %vm2279_vm14, %vm1364_vm7  ;;  %vm2288_vm14 = vcmp.ne.s32.totalorder %v233_v42, %v1288_v16  ;;  %v876_v40 = vsel %vm1450_vm2, 1.0, %v2223_v10 }
 0x10c   :  { %2277 = vst [vmem:[#allocation5_spill] sm:$0xff] %v2276_v56  ;;  %v1462_v59 = vpop.f32.mrb[2].mxu0  ;;  %v1464_v60 = vpop.f32.mrb[2].mxu1  ;;  %vm2287_vm8 = vmmov %vm2283_vm0 }
 0x10d   :  { %2278 = vst [vmem:[#allocation6_spill] sm:$0xff] %v1464_v60  ;;  %v1479_v63 = vpop.f32.mrb[3].mxu0  ;;  %v1481_v0 = vpop.f32.mrb[3].mxu1  ;;  %vm1498_vm10 = vmand %vm2288_vm14, %vm2287_vm8  ;;  %v1516_v6 = vsel %vm1341_vm12, %v1462_v59, -1e+30  ;;  %vm370_vm12 = vcmp.eq.s32.totalorder %v1316_v27, %v1330_v30 }
 0x10e   :  { %2282 = vst [vmem:[#allocation7_spill] sm:$0xff] %v1481_v0  ;;  %427 = vmax.xlane.f32.xlu1 %v1477_v62  ;;  %411 = vmax.xlane.f32.xlu0 %v1443_v55  ;;  %v1511_v5 = vsel %vm2274_vm4, %v1481_v0, -1e+30  ;;  %vm1523_vm0 = vmand %vm2291_vm9, %vm1371_vm15  ;;  %v1560_v22 = vsel %vm1364_vm7, %v1464_v60, -1e+30  ;;  %vm266_vm7 = vcmp.ne.s32.totalorder %v231_v24, %v1288_v16  ;;  %vm275_vm9 = vcmp.ne.s32.totalorder %v240_v33, %v1288_v16 }
 0x10f   :  { %v2293_v7 = vsel %vm1523_vm0, 4294967295, %v2292_v7  ;;  %vm1543_vm4 = vmand %vm375_vm13, %vm1488_vm11  ;;  %v1608_v39 = vsel %vm1357_vm3, %v1479_v63, -1e+30  ;;  %vm274_vm3 = vcmp.ne.s32.totalorder %v239_v37, %v1288_v16  ;;  %v241_v24 = vadd.s32 120, %v1283_v13 }
 0x110   :  { %v1535_v12 = vpop.f32.mrb[4].mxu0  ;;  %v1537_v15 = vpop.f32.mrb[4].mxu1  ;;  %v2296_v17 = vsel %vm1543_vm4, 4294967295, %v2295_v17  ;;  %vm1570_vm13 = vmand %vm370_vm12, %vm1498_vm10  ;;  %v2335_v0 = vmov 0.0  }
 0x111   :  { %2294 = vst [vmem:[#allocation8_spill] sm:$0xff] %v1537_v15  ;;  %2297 = vst [vmem:[#allocation9_spill] sm:$0xff] %v2296_v17  ;;  %v1547_v18 = vpop.f32.mrb[5].mxu0  ;;  %v1549_v19 = vpop.f32.mrb[5].mxu1 }
 0x112   :  { %2298 = vst [vmem:[#allocation10_spill] sm:$0xff] %v1549_v19  ;;  %431 = vmax.xlane.f32.xlu1 %v1511_v5  ;;  %417 = vmax.xlane.f32.xlu0 %v1516_v6  ;;  %v1565_v23 = vsel %vm1371_vm15, %v1547_v18, -1e+30  ;;  %vm267_vm15 = vcmp.ne.s32.totalorder %v232_v20, %v1288_v16  ;;  %v1595_v36 = vsel %vm1488_vm11, %v1549_v19, -1e+30  ;;  %vm2304_vm11 = vmmov %vm2287_vm8 }
 0x113   :  { %vm1601_vm14 = vmand %vm267_vm15, %vm2287_vm8 }
 0x114   :  { %v1577_v27 = vpop.f32.mrb[6].mxu0  ;;  %v1579_v28 = vpop.f32.mrb[6].mxu1  ;;  %vm1615_vm12 = vmand %vm266_vm7, %vm2304_vm11  ;;  %v2348_v25 = vld [vmem:[#allocation6_spill] sm:$0xff] }
 0x115   :  { %v1581_v29 = vpop.f32.mrb[7].mxu0  ;;  %v1584_v32 = vpop.f32.mrb[7].mxu1  ;;  %vm2307_vm15 = vmmov %vm2287_vm8  ;;  %v1634_v52 = vsel %vm1615_vm12, %v1535_v12, -1e+30  ;;  %v1661_v37 = vsel %vm1498_vm10, %v1577_v27, -1e+30  ;;  %vm363_vm10 = vcmp.eq.s32.totalorder %v1279_v9, %v1330_v30 }
 0x116   :  { %2301 = vst [vmem:[#allocation11_spill] sm:$0xff] %v1584_v32  ;;  %433 = vmax.xlane.f32.xlu0 %v1560_v22  ;;  %419 = vmax.xlane.f32.xlu1 %v1565_v23  ;;  %v1622_v42 = vsel %vm1601_vm14, %v1581_v29, -1e+30  ;;  %vm1627_vm8 = vmand %vm275_vm9, %vm2307_vm15  ;;  %vm276_vm9 = vcmp.ne.s32.totalorder %v241_v24, %v1288_v16  ;;  %v308_v16 = vld [vmem:[%s2207_s0 + $0x70] sm:$0xff] }
 0x117   :  { %vm2310_vm7 = vmmov %vm2304_vm11  ;;  %v1647_v20 = vsel %vm1627_vm8, %v1584_v32, -1e+30 }
 0x118   :  { %vm1640_vm11 = vmand %vm274_vm3, %vm2310_vm7 }
 0x119   :  { %v1653_v33 = vsel %vm1640_vm11, %v1537_v15, -1e+30  ;;  %vm2313_vm3 = vmmov %vm2310_vm7  ;;  %vm2316_vm7 = vnez %v2252_v31  ;;  %v870_v31 = vsel %vm1523_vm0, 1.0, %v2223_v10 }
 0x11a   :  { %415 = vmax.xlane.f32.xlu0 %v1608_v39  ;;  %435 = vmax.xlane.f32.xlu1 %v1595_v36  ;;  %vm1666_vm15 = vmand %vm276_vm9, %vm2313_vm3  ;;  %vm369_vm3 = vcmp.eq.s32.totalorder %v1285_v14, %v1330_v30  ;;  %v869_v14 = vsel %vm1433_vm6, 1.0, %v2223_v10 }
 0x11b   :  { %v1673_v26 = vsel %vm1666_vm15, %v1579_v28, -1e+30  ;;  %vm1686_vm9 = vmand %vm363_vm10, %vm2316_vm7  ;;  %vm2319_vm10 = vnez %v2264_v41 }
 0x11c   :  { %v866_v8 = vsel %vm1686_vm9, 1.0, %v2223_v10  ;;  %v867_v9 = vsel %vm2319_vm10, 1.0, %v2223_v10  ;;  %vm1706_vm7 = vmand %vm369_vm3, %vm1601_vm14  ;;  %vm2324_vm14 = vnez %v2266_v43  ;;  %v2337_v13 = vsel %vm2319_vm10, %v1391_v44, 0.0  ;;  %v2356_v43 = vld [vmem:[#allocation10_spill] sm:$0xff] }
 0x11e   :  { %421 = vmax.xlane.f32.xlu0 %v1634_v52  ;;  %423 = vmax.xlane.f32.xlu1 %v1622_v42 }
 0x122   :  { %437 = vmax.xlane.f32.xlu0 %v1653_v33  ;;  %439 = vmax.xlane.f32.xlu1 %v1647_v20 }
 0x126   :  { %425 = vmax.xlane.f32.xlu0 %v1661_v37 }
 0x12a   :  { %441 = vmax.xlane.f32.xlu0 %v1673_v26 }
 0x133   :  { %357 = vperm.xlu1 %1024, %v309_v2   ;;  %v868_v2 = vsel %vm1421_vm1, 1.0, %v2223_v10  ;;  %vm368_vm1 = vcmp.eq.s32.totalorder %v1281_v11, %v1330_v30 }
 0x134   :  { %vm1720_vm0 = vmand %vm368_vm1, %vm1615_vm12  ;;  %vm2325_vm1 = vnez %v2268_v46  ;;  %v2353_v46 = vld [vmem:[#allocation7_spill] sm:$0xff] }
 0x135   :  { %v871_v11 = vsel %vm1720_vm0, 1.0, %v2223_v10  ;;  %v576_v53 = vsel %vm1720_vm0, %v1535_v12, 0.0  ;;  %vm2343_vm0 = vnez %v2293_v7 }
 0x140   :  { %354 = vperm.xlu0 %1023, %v308_v16   ;;  %v872_v16 = vsel %vm1706_vm7, 1.0, %v2223_v10 }
 0x157   :  { %651 = vadd.xlane.f32.xlu1 %v866_v8 }
 0x15b   :  { %655 = vadd.xlane.f32.xlu1 %v868_v2  ;;  %v874_v2 = vsel %vm2324_vm14, 1.0, %v2223_v10 }
 0x15f   :  { %653 = vadd.xlane.f32.xlu0 %v867_v9  ;;  %659 = vadd.xlane.f32.xlu1 %v870_v31  ;;  %v873_v9 = vsel %vm1570_vm13, 1.0, %v2223_v10  ;;  %v875_v31 = vsel %vm2325_vm1, 1.0, %v2223_v10 }
 0x163   :  { %657 = vadd.xlane.f32.xlu0 %v869_v14  ;;  %663 = vadd.xlane.f32.xlu1 %v872_v16  ;;  %v878_v14 = vsel %vm1543_vm4, 1.0, %v2223_v10  ;;  %v352_v16 = vpop.permute.xlu1 %351 }
 0x164   :  { %vm376_vm12 = vcmp.eq.s32.totalorder %v352_v16, %v1330_v30 }
 0x165   :  { %vm1748_vm3 = vmand %vm376_vm12, %vm1640_vm11 }
 0x167   :  { %661 = vadd.xlane.f32.xlu0 %v871_v11  ;;  %667 = vadd.xlane.f32.xlu1 %v874_v2  ;;  %v877_v11 = vsel %vm1470_vm5, 1.0, %v2223_v10  ;;  %v2326_v2 = vmov 0 }
 0x168   :  { %v2327_v2 = vsel %vm1748_vm3, 4294967295, %v2326_v2 }
 0x169   :  { %2328 = vst [vmem:[#allocation12_spill] sm:$0xff] %v2327_v2 }
 0x16b   :  { %665 = vadd.xlane.f32.xlu0 %v873_v9  ;;  %671 = vadd.xlane.f32.xlu1 %v876_v40  ;;  %v879_v9 = vsel %vm1748_vm3, 1.0, %v2223_v10 }
 0x16f   :  { %669 = vadd.xlane.f32.xlu0 %v875_v31  ;;  %675 = vadd.xlane.f32.xlu1 %v878_v14 }
 0x173   :  { %673 = vadd.xlane.f32.xlu0 %v877_v11 }
 0x177   :  { %677 = vadd.xlane.f32.xlu0 %v879_v9 }
 0x197   :  { %v1755_v40 = vpop.xlane.xlu0 %429  ;;  %v1757_v31 = vpop.xlane.xlu1 %413 }
 0x198   :  { %2329 = vst [vmem:[#allocation13_spill] sm:$0xff] %v1755_v40  ;;  %v452_v32 = vsub.f32 %v1407_v48, %v1755_v40  ;;  %v444_v2 = vsub.f32 %v1412_v49, %v1757_v31 }
 0x19a   :  { %v477_v48 = vmul.f32 1.442695, %v452_v32 }
 0x19b   :  { %v1759_v14 = vpop.xlane.xlu1 %427  ;;  %v1761_v16 = vpop.xlane.xlu0 %411 }
 0x19c   :  { %1025 = vpow2.f32 %v477_v48 }
 0x19f   :  { %v1763_v11 = vpop.xlane.xlu1 %431  ;;  %v1765_v1 = vpop.xlane.xlu0 %417 }
 0x1a0   :  { %v446_v60 = vsub.f32 %v1516_v6, %v1765_v1  ;;  %v453_v12 = vsub.f32 %v1511_v5, %v1763_v11 }
 0x1a2   :  { %v465_v32 = vmul.f32 1.442695, %v446_v60  ;;  %v451_v60 = vsub.f32 %v1477_v62, %v1759_v14 }
 0x1a3   :  { %v1767_v58 = vpop.xlane.xlu0 %433  ;;  %v1769_v57 = vpop.xlane.xlu1 %419 }
 0x1a4   :  { %v454_v41 = vsub.f32 %v1560_v22, %v1767_v58  ;;  %v475_v22 = vmul.f32 1.442695, %v451_v60 }
 0x1a7   :  { %v1771_v34 = vpop.xlane.xlu0 %415  ;;  %v1773_v21 = vpop.xlane.xlu1 %435 }
 0x1a8   :  { %2330 = vst [vmem:[#allocation14_spill] sm:$0xff] %v1773_v21  ;;  %v445_v6 = vsub.f32 %v1608_v39, %v1771_v34  ;;  %v479_v39 = vmul.f32 1.442695, %v453_v12  ;;  %v577_v12 = vsel %vm1706_vm7, %v1581_v29, 0.0 }
 0x1aa   :  { %v463_v62 = vmul.f32 1.442695, %v445_v6 }
 0x1ab   :  { %v1775_v9 = vpop.xlane.xlu0 %421  ;;  %v1777_v4 = vpop.xlane.xlu1 %423 }
 0x1ac   :  { %2331 = vst [vmem:[#allocation15_spill] sm:$0xff] %v1777_v4  ;;  %v448_v35 = vsub.f32 %v1634_v52, %v1775_v9 }
 0x1ae   :  { %v469_v5 = vmul.f32 1.442695, %v448_v35  ;;  %v2347_v35 = vsel %vm2324_vm14, %v1402_v47, 0.0  ;;  %v2357_v47 = vsel %vm1543_vm4, %v2356_v43, 0.0 }
 0x1af   :  { %v1779_v3 = vpop.xlane.xlu0 %437  ;;  %v1781_v54 = vpop.xlane.xlu1 %439 }
 0x1b0   :  { %2332 = vst [vmem:[#allocation16_spill] sm:$0xff] %v1781_v54  ;;  %v456_v24 = vsub.f32 %v1653_v33, %v1779_v3 }
 0x1b3   :  { %v358_v10 = vpop.permute.xlu1 %357  ;;  %v1786_v19 = vpop.xlane.xlu0 %425 }
 0x1b4   :  { %vm378_vm11 = vcmp.eq.s32.totalorder %v358_v10, %v1330_v30  ;;  %v443_v10 = vsub.f32 %v1443_v55, %v1761_v16  ;;  %v2338_v55 = vsel %vm1433_vm6, %v1462_v59, 0.0  ;;  %v461_v59 = vmul.f32 1.442695, %v444_v2 }
 0x1b5   :  { %vm1790_vm12 = vmand %vm378_vm11, %vm1666_vm15  ;;  %v447_v2 = vsub.f32 %v1565_v23, %v1769_v57  ;;  %vm2341_vm6 = vnez %v2271_v51  ;;  %v2344_v23 = vsel %vm2343_vm0, %v1547_v18, 0.0  ;;  %v485_v51 = vmul.f32 1.442695, %v456_v24 }
 0x1b6   :  { %v881_v56 = vsel %vm1790_vm12, 1.0, %v2335_v0  ;;  %v459_v15 = vmul.f32 1.442695, %v443_v10  ;;  %v455_v10 = vsub.f32 %v1595_v36, %v1773_v21  ;;  %v2358_v61 = vsel %vm1790_vm12, %v1579_v28, 0.0 }
 0x1b7   :  { %681 = vadd.xlane.f32.xlu0 %v881_v56  ;;  %v1802_v40 = vpop.xlane.xlu0 %441  ;;  %v467_v52 = vmul.f32 1.442695, %v447_v2  ;;  %v2354_v2 = vsel %vm1450_vm2, %v2353_v46, 0.0  ;;  %vm843_vm0 = vcmask 7168  }
 0x1b8   :  { %2336 = vst [vmem:[#allocation17_spill] sm:$0xff] %v1802_v40  ;;  %1027 = vpow2.f32 %v459_v15  ;;  %v1026_v15 = vpop.eup %1025  ;;  %v483_v33 = vmul.f32 1.442695, %v455_v10  ;;  %v458_v18 = vsub.f32 %v1673_v26, %v1802_v40 }
 0x1b9   :  { %1029 = vpow2.f32 %v465_v32 }
 0x1ba   :  { %1031 = vpow2.f32 %v461_v59 }
 0x1bb   :  { %589 = vadd.xlane.f32.xlu0 %v2337_v13 }
 0x1bf   :  { %v355_v56 = vpop.permute.xlu0 %354  ;;  %593 = vadd.xlane.f32.xlu0 %v2338_v55  ;;  %v449_v55 = vsub.f32 %v1622_v42, %v1777_v4 }
 0x1c0   :  { %vm377_vm15 = vcmp.eq.s32.totalorder %v355_v56, %v1330_v30  ;;  %v481_v30 = vmul.f32 1.442695, %v454_v41 }
 0x1c1   :  { %vm1821_vm10 = vmand %vm377_vm15, %vm1627_vm8  ;;  %v471_v41 = vmul.f32 1.442695, %v449_v55 }
 0x1c2   :  { %v880_v49 = vsel %vm1821_vm10, 1.0, %v2335_v0  ;;  %v571_v0 = vsel %vm1686_vm9, %v1414_v50, 0.0  ;;  %1033 = vpow2.f32 %v481_v30  ;;  %v1028_v38 = vpop.eup %1027  ;;  %v2342_v50 = vsel %vm2341_vm6, %v1479_v63, 0.0 }
 0x1c3   :  { %679 = vadd.xlane.f32.xlu1 %v880_v49  ;;  %597 = vadd.xlane.f32.xlu0 %v576_v53  ;;  %1035 = vpow2.f32 %v475_v22  ;;  %v1030_v48 = vpop.eup %1029  ;;  %v450_v63 = vsub.f32 %v1661_v37, %v1786_v19  ;;  %v457_v37 = vsub.f32 %v1647_v20, %v1781_v54  ;;  %v489_v49 = vmul.f32 1.442695, %v458_v18 }
 0x1c4   :  { %1037 = vpow2.f32 %v463_v62  ;;  %v1032_v13 = vpop.eup %1031  ;;  %v2345_v22 = vsel %vm1570_vm13, %v1577_v27, 0.0  ;;  %v2346_v62 = vsel %vm2325_vm1, %v1393_v45, 0.0  ;;  %v2349_v27 = vsel %vm1470_vm5, %v2348_v25, 0.0 }
 0x1c5   :  { %1039 = vpow2.f32 %v479_v39  ;;  %v473_v7 = vmul.f32 1.442695, %v450_v63  ;;  %v487_v59 = vmul.f32 1.442695, %v457_v37 }
 0x1c6   :  { %1041 = vpow2.f32 %v469_v5 }
 0x1c7   :  { %587 = vadd.xlane.f32.xlu1 %v571_v0  ;;  %509 = vadd.xlane.f32.xlu0 %v1026_v15  ;;  %1043 = vpow2.f32 %v467_v52 }
 0x1c8   :  { %1045 = vpow2.f32 %v485_v51 }
 0x1c9   :  { %1047 = vpow2.f32 %v483_v33 }
 0x1ca   :  { %1049 = vpow2.f32 %v473_v7 }
 0x1cb   :  { %591 = vadd.xlane.f32.xlu1 %v2342_v50  ;;  %491 = vadd.xlane.f32.xlu0 %v1028_v38  ;;  %1051 = vpow2.f32 %v471_v41  ;;  %v2350_v38 = vld [vmem:[#allocation8_spill] sm:$0xff]  ;;  %v2359_v50 = vld [vmem:[#allocation11_spill] sm:$0xff] }
 0x1cc   :  { %v1034_v56 = vpop.eup %1033  ;;  %1053 = vpow2.f32 %v489_v49  ;;  %v584_v29 = vsel %vm1748_vm3, %v2350_v38, 0.0  ;;  %v585_v5 = vsel %vm1821_vm10, %v2359_v50, 0.0 }
 0x1cd   :  { %v1036_v36 = vpop.eup %1035  ;;  %1055 = vpow2.f32 %v487_v59 }
 0x1ce   :  { %v1038_v32 = vpop.eup %1037 }
 0x1cf   :  { %595 = vadd.xlane.f32.xlu1 %v2344_v23  ;;  %497 = vadd.xlane.f32.xlu0 %v1030_v48  ;;  %v1040_v53 = vpop.eup %1039 }
 0x1d0   :  { %v1042_v42 = vpop.eup %1041 }
 0x1d1   :  { %v1044_v60 = vpop.eup %1043 }
 0x1d2   :  { %v1046_v26 = vpop.eup %1045 }
 0x1d3   :  { %493 = vadd.xlane.f32.xlu1 %v1032_v13  ;;  %513 = vadd.xlane.f32.xlu0 %v1034_v56  ;;  %v1048_v30 = vpop.eup %1047 }
 0x1d4   :  { %v1050_v6 = vpop.eup %1049 }
 0x1d5   :  { %v1052_v15 = vpop.eup %1051 }
 0x1d6   :  { %v1054_v20 = vpop.eup %1053 }
 0x1d7   :  { %507 = vadd.xlane.f32.xlu1 %v1036_v36  ;;  %495 = vadd.xlane.f32.xlu0 %v1038_v32  ;;  %v1056_v0 = vpop.eup %1055 }
 0x1db   :  { %511 = vadd.xlane.f32.xlu1 %v1040_v53  ;;  %501 = vadd.xlane.f32.xlu0 %v1042_v42 }
 0x1df   :  { %499 = vadd.xlane.f32.xlu1 %v1044_v60  ;;  %517 = vadd.xlane.f32.xlu0 %v1046_v26 }
 0x1e3   :  { %515 = vadd.xlane.f32.xlu1 %v1048_v30  ;;  %505 = vadd.xlane.f32.xlu0 %v1050_v6 }
 0x1e4   :  { %v1905_v52 = vpop.xlane.xlu1 %651 }
 0x1e5   :  { %vm715_vm2 = vcmp.lt.f32.partialorder %v1905_v52, 1e-06 }
 0x1e6   :  { %v731_v32 = vsel %vm715_vm2, 1.0, %v1905_v52 }
 0x1e7   :  { %503 = vadd.xlane.f32.xlu1 %v1052_v15  ;;  %521 = vadd.xlane.f32.xlu0 %v1054_v20  ;;  %1057 = vrcp.f32 %v731_v32 }
 0x1e8   :  { %v1909_v23 = vpop.xlane.xlu1 %655 }
 0x1e9   :  { %vm717_vm5 = vcmp.lt.f32.partialorder %v1909_v23, 1e-06 }
 0x1ea   :  { %v733_v49 = vsel %vm717_vm5, 1.0, %v1909_v23 }
 0x1eb   :  { %519 = vadd.xlane.f32.xlu1 %v1056_v0  ;;  %601 = vadd.xlane.f32.xlu0 %v2345_v22  ;;  %1059 = vrcp.f32 %v733_v49 }
 0x1ec   :  { %v1901_v24 = vpop.xlane.xlu0 %653  ;;  %v1913_v17 = vpop.xlane.xlu1 %659 }
 0x1ed   :  { %vm716_vm4 = vcmp.lt.f32.partialorder %v1901_v24, 1e-06  ;;  %vm719_vm13 = vcmp.lt.f32.partialorder %v1913_v17, 1e-06 }
 0x1ee   :  { %v732_v53 = vsel %vm716_vm4, 1.0, %v1901_v24  ;;  %v735_v42 = vsel %vm719_vm13, 1.0, %v1913_v17 }
 0x1ef   :  { %599 = vadd.xlane.f32.xlu1 %v577_v12  ;;  %605 = vadd.xlane.f32.xlu0 %v2346_v62  ;;  %1061 = vrcp.f32 %v732_v53 }
 0x1f0   :  { %v1903_v48 = vpop.xlane.xlu0 %657  ;;  %v1917_v63 = vpop.xlane.xlu1 %663  ;;  %1063 = vrcp.f32 %v735_v42 }
 0x1f1   :  { %2361 = vst [vmem:[#allocation8_spill] sm:$0xff] %v1917_v63  ;;  %vm718_vm8 = vcmp.lt.f32.partialorder %v1903_v48, 1e-06  ;;  %vm721_vm9 = vcmp.lt.f32.partialorder %v1917_v63, 1e-06  ;;  %v1058_v12 = vpop.eup %1057 }
 0x1f2   :  { %v1952_v26 = vsel %vm718_vm8, 1.0, %v1903_v48  ;;  %v1957_v30 = vsel %vm721_vm9, 1.0, %v1917_v63  ;;  %v763_v39 = vmul.f32 %v1058_v12, %v731_v32 }
 0x1f3   :  { %603 = vadd.xlane.f32.xlu1 %v2347_v35  ;;  %609 = vadd.xlane.f32.xlu0 %v2349_v27  ;;  %1065 = vrcp.f32 %v1952_v26 }
 0x1f4   :  { %v1907_v10 = vpop.xlane.xlu0 %661  ;;  %v1921_v13 = vpop.xlane.xlu1 %667 }
 0x1f5   :  { %2362 = vst [vmem:[#allocation12_spill] sm:$0xff] %v1921_v13  ;;  %vm720_vm7 = vcmp.lt.f32.partialorder %v1907_v10, 1e-06  ;;  %vm723_vm14 = vcmp.lt.f32.partialorder %v1921_v13, 1e-06  ;;  %v1060_v27 = vpop.eup %1059 }
 0x1f6   :  { %v736_v6 = vsel %vm720_vm7, 1.0, %v1907_v10  ;;  %v1965_v0 = vsel %vm723_vm14, 1.0, %v1921_v13  ;;  %v765_v43 = vmul.f32 %v1060_v27, %v733_v49 }
 0x1f7   :  { %607 = vadd.xlane.f32.xlu1 %v2354_v2  ;;  %613 = vadd.xlane.f32.xlu0 %v584_v29 }
 0x1f8   :  { %v1911_v51 = vpop.xlane.xlu0 %665  ;;  %v1927_v55 = vpop.xlane.xlu1 %671  ;;  %v781_v63 = vsub.f32 2.0, %v765_v43 }
 0x1f9   :  { %2360 = vst [vmem:[#allocation6_spill] sm:$0xff] %v1911_v51  ;;  %2365 = vst [vmem:[#allocation9_spill] sm:$0xff] %v1927_v55  ;;  %vm722_vm1 = vcmp.lt.f32.partialorder %v1911_v51, 1e-06  ;;  %vm725_vm3 = vcmp.lt.f32.partialorder %v1927_v55, 1e-06  ;;  %v1985_v29 = vpop.eup %1061 }
 0x1fa   :  { %v1970_v22 = vsel %vm722_vm1, 1.0, %v1911_v51  ;;  %v1977_v25 = vsel %vm725_vm3, 1.0, %v1927_v55  ;;  %v1991_v45 = vpop.eup %1063  ;;  %v764_v21 = vmul.f32 %v1985_v29, %v732_v53  ;;  %v2023_v13 = vmul.f32 %v1060_v27, %v781_v63 }
 0x1fb   :  { %611 = vadd.xlane.f32.xlu1 %v2357_v47  ;;  %617 = vadd.xlane.f32.xlu0 %v2358_v61  ;;  %v767_v4 = vmul.f32 %v1991_v45, %v735_v42 }
 0x1fc   :  { %v1915_v28 = vpop.xlane.xlu0 %669  ;;  %v1932_v18 = vpop.xlane.xlu1 %675 }
 0x1fd   :  { %2366 = vst [vmem:[#allocation10_spill] sm:$0xff] %v1932_v18  ;;  %vm724_vm11 = vcmp.lt.f32.partialorder %v1915_v28, 1e-06  ;;  %vm727_vm12 = vcmp.lt.f32.partialorder %v1932_v18, 1e-06  ;;  %v1998_v61 = vpop.eup %1065 }
 0x1fe   :  { %v1982_v38 = vsel %vm724_vm11, 1.0, %v1915_v28  ;;  %v1989_v8 = vsel %vm727_vm12, 1.0, %v1932_v18 }
 0x1ff   :  { %615 = vadd.xlane.f32.xlu1 %v585_v5  ;;  %v779_v5 = vsub.f32 2.0, %v763_v39 }
 0x200   :  { %v1919_v44 = vpop.xlane.xlu0 %673 }
 0x201   :  { %vm726_vm15 = vcmp.lt.f32.partialorder %v1919_v44, 1e-06  ;;  %v795_v55 = vmul.f32 %v1058_v12, %v779_v5  ;;  %v783_v5 = vsub.f32 2.0, %v767_v4 }
 0x202   :  { %v1995_v47 = vsel %vm726_vm15, 1.0, %v1919_v44 }
 0x204   :  { %v1923_v56 = vpop.xlane.xlu0 %677 }
 0x205   :  { %2363 = vst [vmem:[#allocation5_spill] sm:$0xff] %v1923_v56  ;;  %vm728_vm10 = vcmp.lt.f32.partialorder %v1923_v56, 1e-06 }
 0x206   :  { %v2006_v49 = vsel %vm728_vm10, 1.0, %v1923_v56 }
 0x244   :  { %v1925_v33 = vpop.xlane.xlu0 %681 }
 0x245   :  { %2364 = vst [vmem:[#allocation7_spill] sm:$0xff] %v1925_v33  ;;  %vm730_vm6 = vcmp.lt.f32.partialorder %v1925_v33, 1e-06 }
 0x248   :  { %v1929_v7 = vpop.xlane.xlu0 %589 }
 0x24c   :  { %v1934_v36 = vpop.xlane.xlu0 %593 }
 0x250   :  { %v1939_v41 = vpop.xlane.xlu0 %597  ;;  %v1941_v37 = vpop.xlane.xlu1 %679 }
 0x251   :  { %vm729_vm2 = vcmp.lt.f32.partialorder %v1941_v37, 1e-06 }
 0x254   :  { %v510_v59 = vpop.xlane.xlu0 %509  ;;  %v1949_v60 = vpop.xlane.xlu1 %587 }
 0x258   :  { %v492_v15 = vpop.xlane.xlu0 %491  ;;  %v1962_v20 = vpop.xlane.xlu1 %591 }
 0x259   :  { %1067 = vlog2.f32 %v492_v15 }
 0x25a   :  { %1069 = vrcp.f32 %v1957_v30 }
 0x25b   :  { %1071 = vrcp.f32 %v736_v6 }
 0x25c   :  { %1073 = vrcp.f32 %v1965_v0  ;;  %v498_v62 = vpop.xlane.xlu0 %497  ;;  %v1974_v35 = vpop.xlane.xlu1 %595 }
 0x25d   :  { %1075 = vlog2.f32 %v498_v62 }
 0x25e   :  { %1077 = vrcp.f32 %v1970_v22 }
 0x25f   :  { %1079 = vrcp.f32 %v1977_v25 }
 0x260   :  { %v514_v46 = vpop.xlane.xlu0 %513  ;;  %v494_v2 = vpop.xlane.xlu1 %493  ;;  %1081 = vrcp.f32 %v1982_v38 }
 0x261   :  { %1083 = vlog2.f32 %v494_v2  ;;  %v2010_v2 = vsel %vm730_vm6, 1.0, %v1925_v33 }
 0x262   :  { %1085 = vrcp.f32 %v1989_v8 }
 0x263   :  { %v1068_v50 = vpop.eup %1067  ;;  %1087 = vrcp.f32 %v1995_v47 }
 0x264   :  { %v2002_v32 = vpop.eup %1069  ;;  %v524_v15 = vmul.f32 0.6931472, %v1068_v50  ;;  %v496_v62 = vpop.xlane.xlu0 %495  ;;  %v766_v50 = vmul.f32 %v1998_v61, %v1952_v26 }
 0x265   :  { %v508_v18 = vpop.xlane.xlu1 %507  ;;  %v1072_v54 = vpop.eup %1071  ;;  %1089 = vlog2.f32 %v496_v62 }
 0x266   :  { %v2012_v39 = vpop.eup %1073  ;;  %1091 = vlog2.f32 %v510_v59  ;;  %v555_v40 = vadd.f32 %v524_v15, %v1761_v16  ;;  %v768_v43 = vmul.f32 %v1072_v54, %v736_v6  ;;  %v780_v16 = vsub.f32 2.0, %v764_v21 }
 0x267   :  { %v1076_v56 = vpop.eup %1075  ;;  %1093 = vrcp.f32 %v2006_v49  ;;  %v771_v12 = vmul.f32 %v2012_v39, %v1965_v0 }
 0x268   :  { %v2019_v53 = vpop.eup %1077  ;;  %1095 = vrcp.f32 %v2010_v2  ;;  %v683_v62 = vmul.f32 %v1905_v52, %v555_v40  ;;  %v530_v33 = vmul.f32 0.6931472, %v1076_v56  ;;  %v502_v42 = vpop.xlane.xlu0 %501  ;;  %v782_v40 = vsub.f32 2.0, %v766_v50 }
 0x269   :  { %v512_v59 = vpop.xlane.xlu1 %511  ;;  %1097 = vlog2.f32 %v502_v42  ;;  %v2027_v26 = vpop.eup %1079  ;;  %v2035_v52 = vmul.f32 %v2002_v32, %v1957_v30  ;;  %v770_v21 = vmul.f32 %v2019_v53, %v1970_v22  ;;  %v784_v56 = vsub.f32 2.0, %v768_v43 }
 0x26a   :  { %v699_v15 = vsub.f32 %v1949_v60, %v683_v62  ;;  %v558_v6 = vadd.f32 %v530_v33, %v1765_v1  ;;  %1099 = vlog2.f32 %v514_v46  ;;  %v2031_v51 = vpop.eup %1081  ;;  %v787_v27 = vsub.f32 2.0, %v771_v12 }
 0x26b   :  { %1101 = vlog2.f32 %v508_v18  ;;  %v1084_v63 = vpop.eup %1083  ;;  %v773_v46 = vmul.f32 %v2027_v26, %v1977_v25  ;;  %v796_v18 = vmul.f32 %v1985_v29, %v780_v16  ;;  %v2049_v62 = vmul.f32 %v1991_v45, %v783_v5 }
 0x26c   :  { %v811_v0 = vmul.f32 -1.0, %v699_v15  ;;  %v686_v4 = vmul.f32 %v1903_v48, %v558_v6  ;;  %1103 = vlog2.f32 %v512_v59  ;;  %v518_v60 = vpop.xlane.xlu0 %517  ;;  %v2040_v33 = vpop.eup %1085  ;;  %v526_v30 = vmul.f32 0.6931472, %v1084_v63 }
 0x26d   :  { %v500_v1 = vpop.xlane.xlu1 %499  ;;  %1105 = vlog2.f32 %v518_v60  ;;  %v2044_v50 = vpop.eup %1087  ;;  %v785_v42 = vsub.f32 2.0, %v2035_v52  ;;  %v786_v59 = vsub.f32 2.0, %v770_v21  ;;  %v798_v15 = vmul.f32 %v1998_v61, %v782_v40 }
 0x26e   :  { %v827_v22 = vmul.f32 %v811_v0, %v795_v55  ;;  %v702_v43 = vsub.f32 %v1934_v36, %v686_v4  ;;  %1107 = vlog2.f32 %v500_v1  ;;  %v556_v12 = vadd.f32 %v526_v30, %v1757_v31 }
 0x26f   :  { %v1090_v48 = vpop.eup %1089  ;;  %v2054_v6 = vmul.f32 %v1072_v54, %v784_v56  ;;  %v789_v5 = vsub.f32 2.0, %v773_v46  ;;  %v2064_v31 = vmul.f32 %v2012_v39, %v787_v27  ;;  %v772_v61 = vmul.f32 %v2031_v51, %v1982_v38 }
 0x270   :  { %v1092_v25 = vpop.eup %1091  ;;  %844 = vst.msk [vmem:[%s2211_s4] sm:$0xff] %vm843_vm0, %v827_v22  ;;  %v814_v55 = vmul.f32 -1.0, %v702_v43  ;;  %v528_v36 = vmul.f32 0.6931472, %v1090_v48  ;;  %v506_v29 = vpop.xlane.xlu0 %505  ;;  %v684_v21 = vmul.f32 %v1901_v24, %v556_v12  ;;  %v2074_v24 = vmul.f32 %v2019_v53, %v786_v59 }
 0x271   :  { %v516_v45 = vpop.xlane.xlu1 %515  ;;  %v2060_v16 = vpop.eup %1093  ;;  %1109 = vlog2.f32 %v506_v29  ;;  %v542_v0 = vmul.f32 0.6931472, %v1092_v25  ;;  %v2078_v60 = vmul.f32 %v2040_v33, %v1989_v8  ;;  %v774_v38 = vmul.f32 %v2044_v50, %v1995_v47  ;;  %v2367_v25 = vld [vmem:[#allocation13_spill] sm:$0xff] }
 0x272   :  { %v2066_v54 = vpop.eup %1095  ;;  %v830_v40 = vmul.f32 %v814_v55, %v798_v15  ;;  %v557_v63 = vadd.f32 %v528_v36, %v1771_v34  ;;  %v700_v4 = vsub.f32 %v1929_v7, %v684_v21  ;;  %1111 = vlog2.f32 %v516_v45 }
 0x273   :  { %v1098_v56 = vpop.eup %1097  ;;  %v776_v46 = vmul.f32 %v2060_v16, %v2006_v49  ;;  %v2092_v8 = vsel %vm729_vm2, 1.0, %v1941_v37  ;;  %v788_v59 = vsub.f32 2.0, %v772_v61  ;;  %v564_v15 = vadd.f32 %v542_v0, %v2367_v25 }
 0x274   :  { %v1100_v39 = vpop.eup %1099  ;;  %847 = vst.msk [vmem:[%s2211_s4 + $0x18] sm:$0xff] %vm843_vm0, %v830_v40  ;;  %v685_v34 = vmul.f32 %v1909_v23, %v557_v63  ;;  %v534_v7 = vmul.f32 0.6931472, %v1098_v56  ;;  %v522_v1 = vpop.xlane.xlu0 %521  ;;  %v812_v47 = vmul.f32 -1.0, %v700_v4  ;;  %v2097_v23 = vmul.f32 %v2027_v26, %v789_v5 }
 0x275   :  { %v504_v27 = vpop.xlane.xlu1 %503  ;;  %v1102_v53 = vpop.eup %1101  ;;  %1113 = vlog2.f32 %v522_v1  ;;  %v546_v12 = vmul.f32 0.6931472, %v1100_v39  ;;  %v792_v40 = vsub.f32 2.0, %v776_v46  ;;  %v692_v4 = vmul.f32 %v1915_v28, %v564_v15 }
 0x276   :  { %v1104_v30 = vpop.eup %1103  ;;  %v701_v22 = vsub.f32 %v1962_v20, %v685_v34  ;;  %v560_v43 = vadd.f32 %v534_v7, %v1775_v9  ;;  %1115 = vlog2.f32 %v504_v27  ;;  %v828_v49 = vmul.f32 %v812_v47, %v796_v18 }
 0x277   :  { %v1106_v48 = vpop.eup %1105  ;;  %1117 = vrcp.f32 %v2092_v8  ;;  %v540_v29 = vmul.f32 0.6931472, %v1102_v53  ;;  %v790_v9 = vsub.f32 2.0, %v774_v38  ;;  %v2108_v18 = vmul.f32 %v2066_v54, %v2010_v2 }
 0x278   :  { %v1108_v55 = vpop.eup %1107  ;;  %v813_v36 = vmul.f32 -1.0, %v701_v22  ;;  %v688_v45 = vmul.f32 %v1907_v10, %v560_v43  ;;  %v602_v20 = vpop.xlane.xlu0 %601  ;;  %845 = vst.msk [vmem:[%s2211_s4 + $0x8] sm:$0xff] %vm843_vm0, %v828_v49  ;;  %v544_v10 = vmul.f32 0.6931472, %v1104_v30  ;;  %v550_v56 = vmul.f32 0.6931472, %v1106_v48 }
 0x279   :  { %v520_v21 = vpop.xlane.xlu1 %519  ;;  %v532_v26 = vmul.f32 0.6931472, %v1108_v55  ;;  %v566_v39 = vadd.f32 %v546_v12, %v1767_v58  ;;  %v563_v7 = vadd.f32 %v540_v29, %v1759_v14  ;;  %v806_v58 = vmul.f32 %v2044_v50, %v790_v9  ;;  %v2370_v29 = vld [vmem:[#allocation9_spill] sm:$0xff] }
 0x27a   :  { %1119 = vlog2.f32 %v520_v21  ;;  %v829_v5 = vmul.f32 %v813_v36, %v2023_v13  ;;  %v704_v61 = vsub.f32 %v1939_v41, %v688_v45  ;;  %v804_v13 = vmul.f32 %v2031_v51, %v788_v59  ;;  %v2371_v21 = vld [vmem:[#allocation17_spill] sm:$0xff] }
 0x27b   :  { %v1110_v63 = vpop.eup %1109  ;;  %v559_v0 = vadd.f32 %v532_v26, %v1769_v57  ;;  %v808_v27 = vmul.f32 %v2060_v16, %v792_v40  ;;  %v794_v53 = vsub.f32 2.0, %v2108_v18  ;;  %v565_v51 = vadd.f32 %v544_v10, %v1763_v11  ;;  %v2368_v16 = vld [vmem:[#allocation6_spill] sm:$0xff]  ;;  %v2369_v11 = vld [vmem:[#allocation12_spill] sm:$0xff] }
 0x27c   :  { %846 = vst.msk [vmem:[%s2211_s4 + $0x10] sm:$0xff] %vm843_vm0, %v829_v5  ;;  %v816_v2 = vmul.f32 -1.0, %v704_v61  ;;  %v538_v38 = vmul.f32 0.6931472, %v1110_v63  ;;  %v606_v34 = vpop.xlane.xlu0 %605  ;;  %v1112_v1 = vpop.eup %1111  ;;  %v694_v43 = vmul.f32 %v1919_v44, %v566_v39  ;;  %v691_v12 = vmul.f32 %v2369_v11, %v563_v7  ;;  %v2372_v5 = vld [vmem:[#allocation15_spill] sm:$0xff]  ;;  %v2373_v63 = vld [vmem:[#allocation5_spill] sm:$0xff] }
 0x27d   :  { %v2120_v41 = vpop.xlane.xlu1 %599  ;;  %v687_v57 = vmul.f32 %v1913_v17, %v559_v0  ;;  %v708_v28 = vsub.f32 %v606_v34, %v692_v4  ;;  %v568_v17 = vadd.f32 %v550_v56, %v1779_v3  ;;  %v548_v50 = vmul.f32 0.6931472, %v1112_v1 }
 0x27e   :  { %v832_v46 = vmul.f32 %v816_v2, %v2054_v6  ;;  %v562_v47 = vadd.f32 %v538_v38, %v1786_v19  ;;  %v693_v45 = vmul.f32 %v2370_v29, %v565_v51  ;;  %v2374_v38 = vld [vmem:[#allocation14_spill] sm:$0xff]  ;;  %v2376_v51 = vld [vmem:[#allocation7_spill] sm:$0xff]  ;;  %v810_v52 = vmul.f32 %v2066_v54, %v794_v53 }
 0x27f   :  { %v1114_v30 = vpop.eup %1113  ;;  %v703_v22 = vsub.f32 %v1974_v35, %v687_v57  ;;  %v820_v14 = vmul.f32 -1.0, %v708_v28  ;;  %v696_v56 = vmul.f32 %v2373_v63, %v568_v17 }
 0x280   :  { %v1116_v48 = vpop.eup %1115  ;;  %849 = vst.msk [vmem:[%s2211_s4 + $0x28] sm:$0xff] %vm843_vm0, %v832_v46  ;;  %v554_v6 = vmul.f32 0.6931472, %v1114_v30  ;;  %v690_v19 = vmul.f32 %v2368_v16, %v562_v47  ;;  %v610_v59 = vpop.xlane.xlu0 %609 }
 0x281   :  { %v604_v49 = vpop.xlane.xlu1 %603  ;;  %v815_v35 = vmul.f32 -1.0, %v703_v22  ;;  %v536_v25 = vmul.f32 0.6931472, %v1116_v48  ;;  %v836_v15 = vmul.f32 %v820_v14, %v804_v13  ;;  %v710_v44 = vsub.f32 %v610_v59, %v694_v43  ;;  %v1118_v55 = vpop.eup %1117 }
 0x282   :  { %v706_v3 = vsub.f32 %v602_v20, %v690_v19  ;;  %v707_v36 = vsub.f32 %v604_v49, %v691_v12  ;;  %v570_v9 = vadd.f32 %v554_v6, %v2371_v21  ;;  %v567_v13 = vadd.f32 %v548_v50, %v2374_v38 }
 0x283   :  { %v831_v26 = vmul.f32 %v815_v35, %v2049_v62  ;;  %853 = vst.msk [vmem:[%s2211_s4 + $0x48] sm:$0xff] %vm843_vm0, %v836_v15  ;;  %v561_v61 = vadd.f32 %v536_v25, %v2372_v5  ;;  %v822_v10 = vmul.f32 -1.0, %v710_v44  ;;  %v2375_v62 = vld [vmem:[#allocation8_spill] sm:$0xff]  ;;  %v777_v28 = vmul.f32 %v1118_v55, %v2092_v8  ;;  %v2378_v8 = vld [vmem:[#allocation10_spill] sm:$0xff] }
 0x284   :  { %v1120_v40 = vpop.eup %1119  ;;  %v818_v0 = vmul.f32 -1.0, %v706_v3  ;;  %v819_v4 = vmul.f32 -1.0, %v707_v36  ;;  %v614_v39 = vpop.xlane.xlu0 %613  ;;  %v698_v30 = vmul.f32 %v2376_v51, %v570_v9  ;;  %v791_v48 = vsub.f32 2.0, %v2078_v60 }
 0x285   :  { %v552_v20 = vmul.f32 0.6931472, %v1120_v40  ;;  %v608_v2 = vpop.xlane.xlu1 %607  ;;  %848 = vst.msk [vmem:[%s2211_s4 + $0x20] sm:$0xff] %vm843_vm0, %v831_v26  ;;  %v689_v34 = vmul.f32 %v2375_v62, %v561_v61  ;;  %v838_v7 = vmul.f32 %v822_v10, %v806_v58  ;;  %v712_v1 = vsub.f32 %v614_v39, %v696_v56  ;;  %v2377_v58 = vld [vmem:[#allocation16_spill] sm:$0xff] }
 0x286   :  { %v709_v57 = vsub.f32 %v608_v2, %v693_v45  ;;  %v834_v46 = vmul.f32 %v818_v0, %v2074_v24  ;;  %v835_v47 = vmul.f32 %v819_v4, %v2064_v31  ;;  %v801_v31 = vmul.f32 %v2002_v32, %v785_v42 }
 0x287   :  { %v705_v22 = vsub.f32 %v2120_v41, %v689_v34  ;;  %855 = vst.msk [vmem:[%s2211_s4 + $0x58] sm:$0xff] %vm843_vm0, %v838_v7  ;;  %v824_v14 = vmul.f32 -1.0, %v712_v1  ;;  %v569_v17 = vadd.f32 %v552_v20, %v2377_v58  ;;  %v695_v41 = vmul.f32 %v2378_v8, %v567_v13 }
 0x288   :  { %v821_v43 = vmul.f32 -1.0, %v709_v57  ;;  %851 = vst.msk [vmem:[%s2211_s4 + $0x38] sm:$0xff] %vm843_vm0, %v834_v46  ;;  %852 = vst.msk [vmem:[%s2211_s4 + $0x40] sm:$0xff] %vm843_vm0, %v835_v47  ;;  %v618_v24 = vpop.xlane.xlu0 %617  ;;  %v793_v32 = vsub.f32 2.0, %v777_v28  ;;  %v807_v18 = vmul.f32 %v2040_v33, %v791_v48 }
 0x289   :  { %v612_v50 = vpop.xlane.xlu1 %611  ;;  %v817_v6 = vmul.f32 -1.0, %v705_v22  ;;  %v840_v60 = vmul.f32 %v824_v14, %v808_v27  ;;  %v714_v19 = vsub.f32 %v618_v24, %v698_v30 }
 0x28a   :  { %v837_v16 = vmul.f32 %v821_v43, %v2097_v23  ;;  %v711_v59 = vsub.f32 %v612_v50, %v695_v41  ;;  %v697_v23 = vmul.f32 %v1941_v37, %v569_v17  ;;  %v809_v35 = vmul.f32 %v1118_v55, %v793_v32 }
 0x28b   :  { %v833_v42 = vmul.f32 %v817_v6, %v801_v31  ;;  %857 = vst.msk [vmem:[%s2211_s4 + $0x68] sm:$0xff] %vm843_vm0, %v840_v60  ;;  %v826_v27 = vmul.f32 -1.0, %v714_v19 }
 0x28c   :  { %854 = vst.msk [vmem:[%s2211_s4 + $0x50] sm:$0xff] %vm843_vm0, %v837_v16  ;;  %v823_v11 = vmul.f32 -1.0, %v711_v59 }
 0x28d   :  { %v616_v54 = vpop.xlane.xlu1 %615  ;;  %850 = vst.msk [vmem:[%s2211_s4 + $0x30] sm:$0xff] %vm843_vm0, %v833_v42  ;;  %v842_v53 = vmul.f32 %v826_v27, %v810_v52 }
 0x28e   :  { %v713_v12 = vsub.f32 %v616_v54, %v697_v23  ;;  %v839_v49 = vmul.f32 %v823_v11, %v807_v18 }
 0x28f   :  { %859 = vst.msk [vmem:[%s2211_s4 + $0x78] sm:$0xff] %vm843_vm0, %v842_v53 }
 0x290   :  { %v825_v25 = vmul.f32 -1.0, %v713_v12  ;;  %856 = vst.msk [vmem:[%s2211_s4 + $0x60] sm:$0xff] %vm843_vm0, %v839_v49 }
 0x292   :  { %v841_v37 = vmul.f32 %v825_v25, %v809_v35 }
 0x294   :  { %858 = vst.msk [vmem:[%s2211_s4 + $0x70] sm:$0xff] %vm843_vm0, %v841_v37 }
 0x295   :  { %864 = vsyncpa [#allocation3], 1 }

</bundles_post_ra>
